<compile_context>
chip_gen: v6e
topology: v6e:2x2x1
jax: 0.10.0
libtpu: 0.0.40
codegen_flags: <defaults>
</compile_context>

<pallas_src>
import functools

import jax
import jax.numpy as jnp
from jax.experimental import pallas as pl
from jax.experimental.pallas import tpu as pltpu


CFG = dict(vocab=100, hidden=32, layers=2, heads=2, intermediate=64,
           max_pos=16, type_vocab=2, num_labels=3)

_OUT_PAD = 128          # lane-dense classifier output width (real labels = 3)
_SMALL_ROWS_PER_LAYER = 8
_SMALL_HDR_ROWS = 4     # emb_ln_g, emb_ln_b, pool_b, fc_b(padded)


# ----------------------------------------------------------------------------
# Fused Pallas kernel: whole BERT forward in one call.
# ----------------------------------------------------------------------------
def _bert_forward_kernel(
    ids_ref, mask_ref, word_emb_ref, pos_type_ref, smalls_ref,
    qkv_w_ref, o_w_ref, w1_ref, w2_ref, pool_w_ref, fc_w_ref,
    out_ref,
    *, num_layers, heads, head_dim, batch, seq, vocab, eps):
    f32 = jnp.float32
    bf16 = jnp.bfloat16
    H = heads * head_dim
    BS = batch * seq
    inter = w1_ref.shape[-1]
    scale = 1.0 / float(head_dim) ** 0.5

    sp = smalls_ref[...]                                     # (24, 128) f32

    def layer_norm(x, g, b):
        mu = jnp.mean(x, axis=-1, keepdims=True)
        xc = x - mu
        var = jnp.mean(xc * xc, axis=-1, keepdims=True)
        return xc * jax.lax.rsqrt(var + eps) * g + b

    def gelu(x):
        # TODO(synk): HF BERT default is exact erf-GELU; tanh approximation used.
        return 0.5 * x * (1.0 + jnp.tanh(0.7978845608028654 *
                                         (x + 0.044715 * x * x * x)))

    # ---- fused embedding lookup: one-hot(ids) @ word_emb + (pos + type) ----
    ids = ids_ref[...]                                       # (BS, 1) int32
    col = jax.lax.broadcasted_iota(jnp.int32, (BS, vocab), 1)
    onehot = (col == ids).astype(f32)                        # (BS, vocab)
    word = jnp.dot(onehot, word_emb_ref[...], preferred_element_type=f32)
    pt = pos_type_ref[...][:seq, :]                          # (S, H)
    pos_type = jnp.concatenate([pt] * batch, axis=0)         # (BS, H)
    x = layer_norm(word + pos_type, sp[0:1, :H], sp[1:2, :H])
    # embedding dropout (p=0.1) eval mode -> identity

    # ---- block-diagonal additive attention bias built in-kernel ----
    r2 = jax.lax.broadcasted_iota(jnp.int32, (BS, BS), 0)
    c2 = jax.lax.broadcasted_iota(jnp.int32, (BS, BS), 1)
    same = None
    for b in range(batch):                                   # static, tiny
        lo, hi = b * seq, (b + 1) * seq
        blk = jnp.logical_and(jnp.logical_and(r2 >= lo, r2 < hi),
                              jnp.logical_and(c2 >= lo, c2 < hi))
        same = blk if same is None else jnp.logical_or(same, blk)
    keep = jnp.logical_and(same, mask_ref[...] > 0.5)        # (BS, BS)
    attn_bias = jnp.where(keep, 0.0, -10000.0)

    for l in range(num_layers):
        base = _SMALL_HDR_ROWS + _SMALL_ROWS_PER_LAYER * l
        qkv_b = sp[base + 0:base + 1, :3 * H]
        o_b   = sp[base + 1:base + 2, :H]
        ln1_g = sp[base + 2:base + 3, :H]
        ln1_b = sp[base + 3:base + 4, :H]
        b1    = sp[base + 4:base + 5, :inter]
        b2    = sp[base + 5:base + 6, :H]
        ln2_g = sp[base + 6:base + 7, :H]
        ln2_b = sp[base + 7:base + 8, :H]

        # ---- self-attention: ONE fused QKV matmul per layer ----
        qkv = jnp.dot(x.astype(bf16), qkv_w_ref[l],
                      preferred_element_type=f32) + qkv_b     # (BS, 3H)
        ctx_heads = []
        for h in range(heads):
            q = qkv[:, h * head_dim:(h + 1) * head_dim]
            k = qkv[:, H + h * head_dim:H + (h + 1) * head_dim]
            v = qkv[:, 2 * H + h * head_dim:2 * H + (h + 1) * head_dim]
            s = jax.lax.dot_general(q, k, (((1,), (1,)), ((), ())),
                                    preferred_element_type=f32) * scale + attn_bias
            s = s - jnp.max(s, axis=-1, keepdims=True)
            p = jnp.exp(s)
            p = p / jnp.sum(p, axis=-1, keepdims=True)        # exact softmax
            ctx_heads.append(jnp.dot(p, v, preferred_element_type=f32))
        ctx = jnp.concatenate(ctx_heads, axis=-1)             # (BS, H)
        # ---- ONE fused output projection across heads ----
        attn = jnp.dot(ctx.astype(bf16), o_w_ref[l],
                       preferred_element_type=f32) + o_b
        # attention-output dropout (p=0.1) eval -> identity
        x = layer_norm(attn + x, ln1_g, ln1_b)

        # ---- feed-forward ----
        hmid = gelu(jnp.dot(x.astype(bf16), w1_ref[l],
                            preferred_element_type=f32) + b1)
        ffn = jnp.dot(hmid.astype(bf16), w2_ref[l],
                      preferred_element_type=f32) + b2
        # FFN dropout (p=0.1) eval -> identity
        x = layer_norm(ffn + x, ln2_g, ln2_b)

    # ---- pooler on CLS rows: static sublane slices (no one-hot matmul) ----
    cls = jnp.concatenate([x[b * seq:b * seq + 1, :] for b in range(batch)],
                          axis=0)                             # (B, H)
    pooled = jnp.tanh(jnp.dot(cls.astype(bf16), pool_w_ref[...],
                              preferred_element_type=f32) + sp[2:3, :H])
    # classifier dropout (p=0.3) eval -> identity
    logits = jnp.dot(pooled.astype(bf16), fc_w_ref[...],
                     preferred_element_type=f32) + sp[3:4, :]  # (B, 128)
    out_ref[...] = logits.astype(out_ref.dtype)


def _full_spec(shape):
    return pl.BlockSpec(shape, lambda: (0,) * len(shape))


# ----------------------------------------------------------------------------
# Parameters
# ----------------------------------------------------------------------------
def init_params(key):
    H, I = CFG["hidden"], CFG["intermediate"]
    init = 0.02

    def nrm(key, shape):
        return init * jax.random.normal(key, shape, dtype=jnp.float32)

    keys = iter(jax.random.split(key, 256))
    p = {
        "word_emb": nrm(next(keys), (CFG["vocab"], H)),
        "pos_emb": nrm(next(keys), (CFG["max_pos"], H)),
        "type_emb": nrm(next(keys), (CFG["type_vocab"], H)),
        "emb_ln_g": jnp.ones((H,), jnp.float32),
        "emb_ln_b": jnp.zeros((H,), jnp.float32),
        "pooler_w": nrm(next(keys), (H, H)),
        "pooler_b": jnp.zeros((H,), jnp.float32),
        "fc_w": nrm(next(keys), (H, CFG["num_labels"])),
        "fc_b": jnp.zeros((CFG["num_labels"],), jnp.float32),
        "layers": [],
    }
    for _ in range(CFG["layers"]):
        lyr = {
            "q_w": nrm(next(keys), (H, H)), "q_b": jnp.zeros((H,), jnp.float32),
            "k_w": nrm(next(keys), (H, H)), "k_b": jnp.zeros((H,), jnp.float32),
            "v_w": nrm(next(keys), (H, H)), "v_b": jnp.zeros((H,), jnp.float32),
            "o_w": nrm(next(keys), (H, H)), "o_b": jnp.zeros((H,), jnp.float32),
            "attn_ln_g": jnp.ones((H,), jnp.float32),
            "attn_ln_b": jnp.zeros((H,), jnp.float32),
            "ffn_w1": nrm(next(keys), (H, I)), "ffn_b1": jnp.zeros((I,), jnp.float32),
            "ffn_w2": nrm(next(keys), (I, H)), "ffn_b2": jnp.zeros((H,), jnp.float32),
            "ffn_ln_g": jnp.ones((H,), jnp.float32),
            "ffn_ln_b": jnp.zeros((H,), jnp.float32),
        }
        p["layers"].append(lyr)
    return p


def pack_params(params):
    """One-time packing: fused bf16 weight slabs + one lane-dense 'smalls' tensor."""
    H, I, L = CFG["hidden"], CFG["intermediate"], CFG["layers"]
    NL = CFG["num_labels"]

    rows = _SMALL_HDR_ROWS + _SMALL_ROWS_PER_LAYER * L
    rows_pad = ((rows + 7) // 8) * 8
    smalls = jnp.zeros((rows_pad, 128), jnp.float32)

    def put(sm, r, vec):
        vec = vec.reshape(-1).astype(jnp.float32)
        return sm.at[r, :vec.shape[0]].set(vec)

    smalls = put(smalls, 0, params["emb_ln_g"])
    smalls = put(smalls, 1, params["emb_ln_b"])
    smalls = put(smalls, 2, params["pooler_b"])
    smalls = put(smalls, 3, params["fc_b"])          # padded to 128 with zeros

    qkv_w, o_w, w1, w2 = [], [], [], []
    for l, lyr in enumerate(params["layers"]):
        qkv_w.append(jnp.concatenate([lyr["q_w"], lyr["k_w"], lyr["v_w"]], axis=1))
        o_w.append(lyr["o_w"])
        w1.append(lyr["ffn_w1"])
        w2.append(lyr["ffn_w2"])
        base = _SMALL_HDR_ROWS + _SMALL_ROWS_PER_LAYER * l
        smalls = put(smalls, base + 0,
                     jnp.concatenate([lyr["q_b"], lyr["k_b"], lyr["v_b"]]))
        smalls = put(smalls, base + 1, lyr["o_b"])
        smalls = put(smalls, base + 2, lyr["attn_ln_g"])
        smalls = put(smalls, base + 3, lyr["attn_ln_b"])
        smalls = put(smalls, base + 4, lyr["ffn_b1"])
        smalls = put(smalls, base + 5, lyr["ffn_b2"])
        smalls = put(smalls, base + 6, lyr["ffn_ln_g"])
        smalls = put(smalls, base + 7, lyr["ffn_ln_b"])

    fc_w_pad = jnp.zeros((H, _OUT_PAD), jnp.float32).at[:, :NL].set(params["fc_w"])
    return dict(
        word_emb=params["word_emb"].astype(jnp.float32),    # exact row gather
        pos_type=(params["pos_emb"]
                  + params["type_emb"][0][None, :]).astype(jnp.float32),
        smalls=smalls,
        qkv_w=jnp.stack(qkv_w).astype(jnp.bfloat16),         # (L, H, 3H)
        o_w=jnp.stack(o_w).astype(jnp.bfloat16),             # (L, H, H)
        w1=jnp.stack(w1).astype(jnp.bfloat16),               # (L, H, I)
        w2=jnp.stack(w2).astype(jnp.bfloat16),               # (L, I, H)
        pool_w=params["pooler_w"].astype(jnp.bfloat16),      # (H, H)
        fc_w=fc_w_pad.astype(jnp.bfloat16),                  # (H, 128)
    )


# ----------------------------------------------------------------------------
# Forward pass: trivial input reshapes + ONE fused pallas_call.
# ----------------------------------------------------------------------------
def bert_sentiment_forward(packed, input_ids, attention_mask):
    B, S = input_ids.shape
    H = CFG["hidden"]
    nh = CFG["heads"]
    L = CFG["layers"]
    NL = CFG["num_labels"]

    ids = input_ids.reshape(B * S, 1).astype(jnp.int32)
    mask = attention_mask.reshape(1, B * S).astype(jnp.float32)

    args = (ids, mask, packed["word_emb"], packed["pos_type"], packed["smalls"],
            packed["qkv_w"], packed["o_w"], packed["w1"], packed["w2"],
            packed["pool_w"], packed["fc_w"])

    kernel = functools.partial(
        _bert_forward_kernel, num_layers=L, heads=nh, head_dim=H // nh,
        batch=B, seq=S, vocab=CFG["vocab"], eps=1e-12)

    out_cols = packed["fc_w"].shape[1]                        # 128, lane-dense
    # vmem limit derived from actual packed footprint (2x for buffering) + headroom
    arg_bytes = sum(int(a.size) * a.dtype.itemsize for a in args) + B * out_cols * 4
    vmem_limit = min(128 * 1024 * 1024, 2 * arg_bytes + (4 << 20))

    out = pl.pallas_call(
        kernel,
        out_shape=jax.ShapeDtypeStruct((B, out_cols), jnp.float32),
        in_specs=[_full_spec(tuple(a.shape)) for a in args],
        out_specs=_full_spec((B, out_cols)),
        compiler_params=pltpu.CompilerParams(vmem_limit_bytes=int(vmem_limit)),
    )(*args)
    return out[:, :NL]


if __name__ == "__main__":
    key = jax.random.PRNGKey(0)
    pkey, ikey = jax.random.split(key)
    params = init_params(pkey)
    packed = pack_params(params)          # one-time packing, outside jit

    B, S = 2, 8
    input_ids = jax.random.randint(ikey, (B, S), 0, CFG["vocab"], dtype=jnp.int32)
    attention_mask = jnp.ones((B, S), dtype=jnp.int32)
    # make the second sequence padded for the last 3 tokens
    attention_mask = attention_mask.at[1, 5:].set(0)

    fwd = jax.jit(bert_sentiment_forward)
    logits = fwd(packed, input_ids, attention_mask)
    jax.block_until_ready(logits)
    assert logits.shape == (B, CFG["num_labels"])
    assert bool(jnp.all(jnp.isfinite(logits)))
    print("KERNEL_OK")
</pallas_src>

<mosaic_0001>
module attributes {stable_mosaic.version = 11 : i64} {
  func.func @_bert_forward_kernel(%arg0: memref<16x1xi32, #tpu.memory_space<vmem>>, %arg1: memref<1x16xf32, #tpu.memory_space<vmem>>, %arg2: memref<100x32xf32, #tpu.memory_space<vmem>>, %arg3: memref<16x32xf32, #tpu.memory_space<vmem>>, %arg4: memref<24x128xf32, #tpu.memory_space<vmem>>, %arg5: memref<2x32x96xbf16, #tpu.memory_space<vmem>>, %arg6: memref<2x32x32xbf16, #tpu.memory_space<vmem>>, %arg7: memref<2x32x64xbf16, #tpu.memory_space<vmem>>, %arg8: memref<2x64x32xbf16, #tpu.memory_space<vmem>>, %arg9: memref<32x32xbf16, #tpu.memory_space<vmem>>, %arg10: memref<32x128xbf16, #tpu.memory_space<vmem>>, %arg11: memref<2x128xf32, #tpu.memory_space<vmem>>) attributes {dimension_semantics = [], scalar_prefetch = 0 : i64, scratch_operands = 0 : i64, tpu.core_type = #tpu.core_type<tc>} {
    %c0 = arith.constant 0 : index
    %c0_0 = arith.constant 0 : index
    %0 = vector.load %arg4[%c0, %c0_0] : memref<24x128xf32, #tpu.memory_space<vmem>>, vector<24x128xf32>
    %c0_1 = arith.constant 0 : index
    %c0_2 = arith.constant 0 : index
    %1 = vector.load %arg0[%c0_1, %c0_2] : memref<16x1xi32, #tpu.memory_space<vmem>>, vector<16x1xi32>
    %2 = tpu.iota {dimensions = array<i32: 1>} : vector<16x100xi32>
    %3 = vector.broadcast %1 : vector<16x1xi32> to vector<16x100xi32>
    %4 = arith.cmpi eq, %2, %3 : vector<16x100xi32>
    %5 = arith.extui %4 : vector<16x100xi1> to vector<16x100xi32>
    %6 = arith.sitofp %5 : vector<16x100xi32> to vector<16x100xf32>
    %c0_3 = arith.constant 0 : index
    %c0_4 = arith.constant 0 : index
    %7 = vector.load %arg2[%c0_3, %c0_4] : memref<100x32xf32, #tpu.memory_space<vmem>>, vector<100x32xf32>
    %cst = arith.constant dense<0.000000e+00> : vector<16x32xf32>
    %8 = tpu.matmul %6, %7, %cst {dimension_numbers = #tpu.dot_dimension_numbers<[1], [0], [0], [1], [0, 0, 1, 1], [], []>} : vector<16x100xf32>, vector<100x32xf32>, vector<16x32xf32> -> vector<16x32xf32>
    %c0_5 = arith.constant 0 : index
    %c0_6 = arith.constant 0 : index
    %9 = vector.load %arg3[%c0_5, %c0_6] : memref<16x32xf32, #tpu.memory_space<vmem>>, vector<16x32xf32>
    %10 = vector.extract_strided_slice %9 {offsets = [0, 0], sizes = [8, 32], strides = [1, 1]} : vector<16x32xf32> to vector<8x32xf32>
    %11 = tpu.concatenate %10, %10 in 0 : vector<8x32xf32>, vector<8x32xf32> -> vector<16x32xf32>
    %12 = arith.addf %8, %11 : vector<16x32xf32>
    %13 = vector.extract_strided_slice %0 {offsets = [0, 0], sizes = [1, 32], strides = [1, 1]} : vector<24x128xf32> to vector<1x32xf32>
    %14 = vector.extract_strided_slice %0 {offsets = [1, 0], sizes = [1, 32], strides = [1, 1]} : vector<24x128xf32> to vector<1x32xf32>
    %cst_7 = arith.constant dense<0.000000e+00> : vector<16xf32>
    %15 = vector.multi_reduction <add>, %12, %cst_7 [1] : vector<16x32xf32> to vector<16xf32>
    %16 = vector.shape_cast %15 : vector<16xf32> to vector<16x1xf32>
    %cst_8 = arith.constant 3.200000e+01 : f32
    %17 = vector.broadcast %cst_8 : f32 to vector<16x1xf32>
    %18 = arith.divf %16, %17 : vector<16x1xf32>
    %19 = vector.broadcast %18 : vector<16x1xf32> to vector<16x32xf32>
    %20 = arith.subf %12, %19 : vector<16x32xf32>
    %21 = arith.mulf %20, %20 : vector<16x32xf32>
    %cst_9 = arith.constant dense<0.000000e+00> : vector<16xf32>
    %22 = vector.multi_reduction <add>, %21, %cst_9 [1] : vector<16x32xf32> to vector<16xf32>
    %23 = vector.shape_cast %22 : vector<16xf32> to vector<16x1xf32>
    %cst_10 = arith.constant 3.200000e+01 : f32
    %24 = vector.broadcast %cst_10 : f32 to vector<16x1xf32>
    %25 = arith.divf %23, %24 : vector<16x1xf32>
    %cst_11 = arith.constant 9.99999996E-13 : f32
    %26 = vector.broadcast %cst_11 : f32 to vector<16x1xf32>
    %27 = arith.addf %25, %26 : vector<16x1xf32>
    %28 = math.rsqrt %27 : vector<16x1xf32>
    %29 = vector.broadcast %28 : vector<16x1xf32> to vector<16x32xf32>
    %30 = arith.mulf %20, %29 : vector<16x32xf32>
    %31 = vector.broadcast %13 : vector<1x32xf32> to vector<16x32xf32>
    %32 = arith.mulf %30, %31 : vector<16x32xf32>
    %33 = vector.broadcast %14 : vector<1x32xf32> to vector<16x32xf32>
    %34 = arith.addf %32, %33 : vector<16x32xf32>
    %35 = tpu.iota {dimensions = array<i32: 0>} : vector<16x16xi32>
    %36 = tpu.iota {dimensions = array<i32: 1>} : vector<16x16xi32>
    %c0_i32 = arith.constant 0 : i32
    %37 = vector.broadcast %c0_i32 : i32 to vector<16x16xi32>
    %38 = arith.cmpi sge, %35, %37 : vector<16x16xi32>
    %c8_i32 = arith.constant 8 : i32
    %39 = vector.broadcast %c8_i32 : i32 to vector<16x16xi32>
    %40 = arith.cmpi slt, %35, %39 : vector<16x16xi32>
    %41 = arith.andi %38, %40 : vector<16x16xi1>
    %c0_i32_12 = arith.constant 0 : i32
    %42 = vector.broadcast %c0_i32_12 : i32 to vector<16x16xi32>
    %43 = arith.cmpi sge, %36, %42 : vector<16x16xi32>
    %c8_i32_13 = arith.constant 8 : i32
    %44 = vector.broadcast %c8_i32_13 : i32 to vector<16x16xi32>
    %45 = arith.cmpi slt, %36, %44 : vector<16x16xi32>
    %46 = arith.andi %43, %45 : vector<16x16xi1>
    %47 = arith.andi %41, %46 : vector<16x16xi1>
    %c8_i32_14 = arith.constant 8 : i32
    %48 = vector.broadcast %c8_i32_14 : i32 to vector<16x16xi32>
    %49 = arith.cmpi sge, %35, %48 : vector<16x16xi32>
    %c16_i32 = arith.constant 16 : i32
    %50 = vector.broadcast %c16_i32 : i32 to vector<16x16xi32>
    %51 = arith.cmpi slt, %35, %50 : vector<16x16xi32>
    %52 = arith.andi %49, %51 : vector<16x16xi1>
    %c8_i32_15 = arith.constant 8 : i32
    %53 = vector.broadcast %c8_i32_15 : i32 to vector<16x16xi32>
    %54 = arith.cmpi sge, %36, %53 : vector<16x16xi32>
    %c16_i32_16 = arith.constant 16 : i32
    %55 = vector.broadcast %c16_i32_16 : i32 to vector<16x16xi32>
    %56 = arith.cmpi slt, %36, %55 : vector<16x16xi32>
    %57 = arith.andi %54, %56 : vector<16x16xi1>
    %58 = arith.andi %52, %57 : vector<16x16xi1>
    %59 = arith.ori %47, %58 : vector<16x16xi1>
    %c0_17 = arith.constant 0 : index
    %c0_18 = arith.constant 0 : index
    %60 = vector.load %arg1[%c0_17, %c0_18] : memref<1x16xf32, #tpu.memory_space<vmem>>, vector<1x16xf32>
    %cst_19 = arith.constant 5.000000e-01 : f32
    %61 = vector.broadcast %cst_19 : f32 to vector<1x16xf32>
    %62 = arith.cmpf ogt, %60, %61 : vector<1x16xf32>
    %63 = vector.broadcast %62 : vector<1x16xi1> to vector<16x16xi1>
    %64 = arith.andi %59, %63 : vector<16x16xi1>
    %cst_20 = arith.constant 0.000000e+00 : f32
    %cst_21 = arith.constant -1.000000e+04 : f32
    %65 = vector.broadcast %cst_20 : f32 to vector<16x16xf32>
    %66 = vector.broadcast %cst_21 : f32 to vector<16x16xf32>
    %67 = arith.select %64, %65, %66 : vector<16x16xi1>, vector<16x16xf32>
    %68 = vector.extract_strided_slice %0 {offsets = [4, 0], sizes = [1, 96], strides = [1, 1]} : vector<24x128xf32> to vector<1x96xf32>
    %69 = vector.extract_strided_slice %0 {offsets = [5, 0], sizes = [1, 32], strides = [1, 1]} : vector<24x128xf32> to vector<1x32xf32>
    %70 = vector.extract_strided_slice %0 {offsets = [6, 0], sizes = [1, 32], strides = [1, 1]} : vector<24x128xf32> to vector<1x32xf32>
    %71 = vector.extract_strided_slice %0 {offsets = [7, 0], sizes = [1, 32], strides = [1, 1]} : vector<24x128xf32> to vector<1x32xf32>
    %72 = vector.extract_strided_slice %0 {offsets = [8, 0], sizes = [1, 64], strides = [1, 1]} : vector<24x128xf32> to vector<1x64xf32>
    %73 = vector.extract_strided_slice %0 {offsets = [9, 0], sizes = [1, 32], strides = [1, 1]} : vector<24x128xf32> to vector<1x32xf32>
    %74 = vector.extract_strided_slice %0 {offsets = [10, 0], sizes = [1, 32], strides = [1, 1]} : vector<24x128xf32> to vector<1x32xf32>
    %75 = vector.extract_strided_slice %0 {offsets = [11, 0], sizes = [1, 32], strides = [1, 1]} : vector<24x128xf32> to vector<1x32xf32>
    %76 = arith.truncf %34 : vector<16x32xf32> to vector<16x32xbf16>
    %c0_22 = arith.constant 0 : index
    %c0_23 = arith.constant 0 : index
    %c0_24 = arith.constant 0 : index
    %77 = vector.load %arg5[%c0_22, %c0_23, %c0_24] : memref<2x32x96xbf16, #tpu.memory_space<vmem>>, vector<1x32x96xbf16>
    %78 = vector.shape_cast %77 : vector<1x32x96xbf16> to vector<32x96xbf16>
    %cst_25 = arith.constant dense<0.000000e+00> : vector<16x96xf32>
    %79 = tpu.matmul %76, %78, %cst_25 {dimension_numbers = #tpu.dot_dimension_numbers<[1], [0], [0], [1], [0, 0, 1, 1], [], []>} : vector<16x32xbf16>, vector<32x96xbf16>, vector<16x96xf32> -> vector<16x96xf32>
    %80 = vector.broadcast %68 : vector<1x96xf32> to vector<16x96xf32>
    %81 = arith.addf %79, %80 : vector<16x96xf32>
    %82 = vector.extract_strided_slice %81 {offsets = [0, 0], sizes = [16, 16], strides = [1, 1]} : vector<16x96xf32> to vector<16x16xf32>
    %83 = vector.extract_strided_slice %81 {offsets = [0, 32], sizes = [16, 16], strides = [1, 1]} : vector<16x96xf32> to vector<16x16xf32>
    %84 = vector.extract_strided_slice %81 {offsets = [0, 64], sizes = [16, 16], strides = [1, 1]} : vector<16x96xf32> to vector<16x16xf32>
    %cst_26 = arith.constant dense<0.000000e+00> : vector<16x16xf32>
    %85 = tpu.matmul %82, %83, %cst_26 {dimension_numbers = #tpu.dot_dimension_numbers<[1], [1], [0], [0], [0, 0, 1, 0], [], []>} : vector<16x16xf32>, vector<16x16xf32>, vector<16x16xf32> -> vector<16x16xf32>
    %cst_27 = arith.constant 2.500000e-01 : f32
    %86 = vector.broadcast %cst_27 : f32 to vector<16x16xf32>
    %87 = arith.mulf %85, %86 : vector<16x16xf32>
    %88 = arith.addf %87, %67 : vector<16x16xf32>
    %cst_28 = arith.constant dense<0xFF800000> : vector<16xf32>
    %89 = vector.multi_reduction <maximumf>, %88, %cst_28 [1] : vector<16x16xf32> to vector<16xf32>
    %90 = vector.shape_cast %89 : vector<16xf32> to vector<16x1xf32>
    %91 = vector.broadcast %90 : vector<16x1xf32> to vector<16x16xf32>
    %92 = arith.subf %88, %91 : vector<16x16xf32>
    %93 = math.exp %92 : vector<16x16xf32>
    %cst_29 = arith.constant dense<0.000000e+00> : vector<16xf32>
    %94 = vector.multi_reduction <add>, %93, %cst_29 [1] : vector<16x16xf32> to vector<16xf32>
    %95 = vector.shape_cast %94 : vector<16xf32> to vector<16x1xf32>
    %96 = vector.broadcast %95 : vector<16x1xf32> to vector<16x16xf32>
    %97 = arith.divf %93, %96 : vector<16x16xf32>
    %cst_30 = arith.constant dense<0.000000e+00> : vector<16x16xf32>
    %98 = tpu.matmul %97, %84, %cst_30 {dimension_numbers = #tpu.dot_dimension_numbers<[1], [0], [0], [1], [0, 0, 1, 1], [], []>} : vector<16x16xf32>, vector<16x16xf32>, vector<16x16xf32> -> vector<16x16xf32>
    %99 = vector.extract_strided_slice %81 {offsets = [0, 16], sizes = [16, 16], strides = [1, 1]} : vector<16x96xf32> to vector<16x16xf32>
    %100 = vector.extract_strided_slice %81 {offsets = [0, 48], sizes = [16, 16], strides = [1, 1]} : vector<16x96xf32> to vector<16x16xf32>
    %101 = vector.extract_strided_slice %81 {offsets = [0, 80], sizes = [16, 16], strides = [1, 1]} : vector<16x96xf32> to vector<16x16xf32>
    %cst_31 = arith.constant dense<0.000000e+00> : vector<16x16xf32>
    %102 = tpu.matmul %99, %100, %cst_31 {dimension_numbers = #tpu.dot_dimension_numbers<[1], [1], [0], [0], [0, 0, 1, 0], [], []>} : vector<16x16xf32>, vector<16x16xf32>, vector<16x16xf32> -> vector<16x16xf32>
    %cst_32 = arith.constant 2.500000e-01 : f32
    %103 = vector.broadcast %cst_32 : f32 to vector<16x16xf32>
    %104 = arith.mulf %102, %103 : vector<16x16xf32>
    %105 = arith.addf %104, %67 : vector<16x16xf32>
    %cst_33 = arith.constant dense<0xFF800000> : vector<16xf32>
    %106 = vector.multi_reduction <maximumf>, %105, %cst_33 [1] : vector<16x16xf32> to vector<16xf32>
    %107 = vector.shape_cast %106 : vector<16xf32> to vector<16x1xf32>
    %108 = vector.broadcast %107 : vector<16x1xf32> to vector<16x16xf32>
    %109 = arith.subf %105, %108 : vector<16x16xf32>
    %110 = math.exp %109 : vector<16x16xf32>
    %cst_34 = arith.constant dense<0.000000e+00> : vector<16xf32>
    %111 = vector.multi_reduction <add>, %110, %cst_34 [1] : vector<16x16xf32> to vector<16xf32>
    %112 = vector.shape_cast %111 : vector<16xf32> to vector<16x1xf32>
    %113 = vector.broadcast %112 : vector<16x1xf32> to vector<16x16xf32>
    %114 = arith.divf %110, %113 : vector<16x16xf32>
    %cst_35 = arith.constant dense<0.000000e+00> : vector<16x16xf32>
    %115 = tpu.matmul %114, %101, %cst_35 {dimension_numbers = #tpu.dot_dimension_numbers<[1], [0], [0], [1], [0, 0, 1, 1], [], []>} : vector<16x16xf32>, vector<16x16xf32>, vector<16x16xf32> -> vector<16x16xf32>
    %116 = tpu.concatenate %98, %115 in 1 : vector<16x16xf32>, vector<16x16xf32> -> vector<16x32xf32>
    %117 = arith.truncf %116 : vector<16x32xf32> to vector<16x32xbf16>
    %c0_36 = arith.constant 0 : index
    %c0_37 = arith.constant 0 : index
    %c0_38 = arith.constant 0 : index
    %118 = vector.load %arg6[%c0_36, %c0_37, %c0_38] : memref<2x32x32xbf16, #tpu.memory_space<vmem>>, vector<1x32x32xbf16>
    %119 = vector.shape_cast %118 : vector<1x32x32xbf16> to vector<32x32xbf16>
    %cst_39 = arith.constant dense<0.000000e+00> : vector<16x32xf32>
    %120 = tpu.matmul %117, %119, %cst_39 {dimension_numbers = #tpu.dot_dimension_numbers<[1], [0], [0], [1], [0, 0, 1, 1], [], []>} : vector<16x32xbf16>, vector<32x32xbf16>, vector<16x32xf32> -> vector<16x32xf32>
    %121 = vector.broadcast %69 : vector<1x32xf32> to vector<16x32xf32>
    %122 = arith.addf %120, %121 : vector<16x32xf32>
    %123 = arith.addf %122, %34 : vector<16x32xf32>
    %cst_40 = arith.constant dense<0.000000e+00> : vector<16xf32>
    %124 = vector.multi_reduction <add>, %123, %cst_40 [1] : vector<16x32xf32> to vector<16xf32>
    %125 = vector.shape_cast %124 : vector<16xf32> to vector<16x1xf32>
    %cst_41 = arith.constant 3.200000e+01 : f32
    %126 = vector.broadcast %cst_41 : f32 to vector<16x1xf32>
    %127 = arith.divf %125, %126 : vector<16x1xf32>
    %128 = vector.broadcast %127 : vector<16x1xf32> to vector<16x32xf32>
    %129 = arith.subf %123, %128 : vector<16x32xf32>
    %130 = arith.mulf %129, %129 : vector<16x32xf32>
    %cst_42 = arith.constant dense<0.000000e+00> : vector<16xf32>
    %131 = vector.multi_reduction <add>, %130, %cst_42 [1] : vector<16x32xf32> to vector<16xf32>
    %132 = vector.shape_cast %131 : vector<16xf32> to vector<16x1xf32>
    %cst_43 = arith.constant 3.200000e+01 : f32
    %133 = vector.broadcast %cst_43 : f32 to vector<16x1xf32>
    %134 = arith.divf %132, %133 : vector<16x1xf32>
    %cst_44 = arith.constant 9.99999996E-13 : f32
    %135 = vector.broadcast %cst_44 : f32 to vector<16x1xf32>
    %136 = arith.addf %134, %135 : vector<16x1xf32>
    %137 = math.rsqrt %136 : vector<16x1xf32>
    %138 = vector.broadcast %137 : vector<16x1xf32> to vector<16x32xf32>
    %139 = arith.mulf %129, %138 : vector<16x32xf32>
    %140 = vector.broadcast %70 : vector<1x32xf32> to vector<16x32xf32>
    %141 = arith.mulf %139, %140 : vector<16x32xf32>
    %142 = vector.broadcast %71 : vector<1x32xf32> to vector<16x32xf32>
    %143 = arith.addf %141, %142 : vector<16x32xf32>
    %144 = arith.truncf %143 : vector<16x32xf32> to vector<16x32xbf16>
    %c0_45 = arith.constant 0 : index
    %c0_46 = arith.constant 0 : index
    %c0_47 = arith.constant 0 : index
    %145 = vector.load %arg7[%c0_45, %c0_46, %c0_47] : memref<2x32x64xbf16, #tpu.memory_space<vmem>>, vector<1x32x64xbf16>
    %146 = vector.shape_cast %145 : vector<1x32x64xbf16> to vector<32x64xbf16>
    %cst_48 = arith.constant dense<0.000000e+00> : vector<16x64xf32>
    %147 = tpu.matmul %144, %146, %cst_48 {dimension_numbers = #tpu.dot_dimension_numbers<[1], [0], [0], [1], [0, 0, 1, 1], [], []>} : vector<16x32xbf16>, vector<32x64xbf16>, vector<16x64xf32> -> vector<16x64xf32>
    %148 = vector.broadcast %72 : vector<1x64xf32> to vector<16x64xf32>
    %149 = arith.addf %147, %148 : vector<16x64xf32>
    %cst_49 = arith.constant 5.000000e-01 : f32
    %150 = vector.broadcast %cst_49 : f32 to vector<16x64xf32>
    %151 = arith.mulf %150, %149 : vector<16x64xf32>
    %cst_50 = arith.constant 4.471500e-02 : f32
    %152 = vector.broadcast %cst_50 : f32 to vector<16x64xf32>
    %153 = arith.mulf %152, %149 : vector<16x64xf32>
    %154 = arith.mulf %153, %149 : vector<16x64xf32>
    %155 = arith.mulf %154, %149 : vector<16x64xf32>
    %156 = arith.addf %149, %155 : vector<16x64xf32>
    %cst_51 = arith.constant 0.797884583 : f32
    %157 = vector.broadcast %cst_51 : f32 to vector<16x64xf32>
    %158 = arith.mulf %157, %156 : vector<16x64xf32>
    %159 = math.tanh %158 : vector<16x64xf32>
    %cst_52 = arith.constant 1.000000e+00 : f32
    %160 = vector.broadcast %cst_52 : f32 to vector<16x64xf32>
    %161 = arith.addf %160, %159 : vector<16x64xf32>
    %162 = arith.mulf %151, %161 : vector<16x64xf32>
    %163 = arith.truncf %162 : vector<16x64xf32> to vector<16x64xbf16>
    %c0_53 = arith.constant 0 : index
    %c0_54 = arith.constant 0 : index
    %c0_55 = arith.constant 0 : index
    %164 = vector.load %arg8[%c0_53, %c0_54, %c0_55] : memref<2x64x32xbf16, #tpu.memory_space<vmem>>, vector<1x64x32xbf16>
    %165 = vector.shape_cast %164 : vector<1x64x32xbf16> to vector<64x32xbf16>
    %cst_56 = arith.constant dense<0.000000e+00> : vector<16x32xf32>
    %166 = tpu.matmul %163, %165, %cst_56 {dimension_numbers = #tpu.dot_dimension_numbers<[1], [0], [0], [1], [0, 0, 1, 1], [], []>} : vector<16x64xbf16>, vector<64x32xbf16>, vector<16x32xf32> -> vector<16x32xf32>
    %167 = vector.broadcast %73 : vector<1x32xf32> to vector<16x32xf32>
    %168 = arith.addf %166, %167 : vector<16x32xf32>
    %169 = arith.addf %168, %143 : vector<16x32xf32>
    %cst_57 = arith.constant dense<0.000000e+00> : vector<16xf32>
    %170 = vector.multi_reduction <add>, %169, %cst_57 [1] : vector<16x32xf32> to vector<16xf32>
    %171 = vector.shape_cast %170 : vector<16xf32> to vector<16x1xf32>
    %cst_58 = arith.constant 3.200000e+01 : f32
    %172 = vector.broadcast %cst_58 : f32 to vector<16x1xf32>
    %173 = arith.divf %171, %172 : vector<16x1xf32>
    %174 = vector.broadcast %173 : vector<16x1xf32> to vector<16x32xf32>
    %175 = arith.subf %169, %174 : vector<16x32xf32>
    %176 = arith.mulf %175, %175 : vector<16x32xf32>
    %cst_59 = arith.constant dense<0.000000e+00> : vector<16xf32>
    %177 = vector.multi_reduction <add>, %176, %cst_59 [1] : vector<16x32xf32> to vector<16xf32>
    %178 = vector.shape_cast %177 : vector<16xf32> to vector<16x1xf32>
    %cst_60 = arith.constant 3.200000e+01 : f32
    %179 = vector.broadcast %cst_60 : f32 to vector<16x1xf32>
    %180 = arith.divf %178, %179 : vector<16x1xf32>
    %cst_61 = arith.constant 9.99999996E-13 : f32
    %181 = vector.broadcast %cst_61 : f32 to vector<16x1xf32>
    %182 = arith.addf %180, %181 : vector<16x1xf32>
    %183 = math.rsqrt %182 : vector<16x1xf32>
    %184 = vector.broadcast %183 : vector<16x1xf32> to vector<16x32xf32>
    %185 = arith.mulf %175, %184 : vector<16x32xf32>
    %186 = vector.broadcast %74 : vector<1x32xf32> to vector<16x32xf32>
    %187 = arith.mulf %185, %186 : vector<16x32xf32>
    %188 = vector.broadcast %75 : vector<1x32xf32> to vector<16x32xf32>
    %189 = arith.addf %187, %188 : vector<16x32xf32>
    %190 = vector.extract_strided_slice %0 {offsets = [12, 0], sizes = [1, 96], strides = [1, 1]} : vector<24x128xf32> to vector<1x96xf32>
    %191 = vector.extract_strided_slice %0 {offsets = [13, 0], sizes = [1, 32], strides = [1, 1]} : vector<24x128xf32> to vector<1x32xf32>
    %192 = vector.extract_strided_slice %0 {offsets = [14, 0], sizes = [1, 32], strides = [1, 1]} : vector<24x128xf32> to vector<1x32xf32>
    %193 = vector.extract_strided_slice %0 {offsets = [15, 0], sizes = [1, 32], strides = [1, 1]} : vector<24x128xf32> to vector<1x32xf32>
    %194 = vector.extract_strided_slice %0 {offsets = [16, 0], sizes = [1, 64], strides = [1, 1]} : vector<24x128xf32> to vector<1x64xf32>
    %195 = vector.extract_strided_slice %0 {offsets = [17, 0], sizes = [1, 32], strides = [1, 1]} : vector<24x128xf32> to vector<1x32xf32>
    %196 = vector.extract_strided_slice %0 {offsets = [18, 0], sizes = [1, 32], strides = [1, 1]} : vector<24x128xf32> to vector<1x32xf32>
    %197 = vector.extract_strided_slice %0 {offsets = [19, 0], sizes = [1, 32], strides = [1, 1]} : vector<24x128xf32> to vector<1x32xf32>
    %198 = arith.truncf %189 : vector<16x32xf32> to vector<16x32xbf16>
    %c1 = arith.constant 1 : index
    %c0_62 = arith.constant 0 : index
    %c0_63 = arith.constant 0 : index
    %199 = vector.load %arg5[%c1, %c0_62, %c0_63] : memref<2x32x96xbf16, #tpu.memory_space<vmem>>, vector<1x32x96xbf16>
    %200 = vector.shape_cast %199 : vector<1x32x96xbf16> to vector<32x96xbf16>
    %cst_64 = arith.constant dense<0.000000e+00> : vector<16x96xf32>
    %201 = tpu.matmul %198, %200, %cst_64 {dimension_numbers = #tpu.dot_dimension_numbers<[1], [0], [0], [1], [0, 0, 1, 1], [], []>} : vector<16x32xbf16>, vector<32x96xbf16>, vector<16x96xf32> -> vector<16x96xf32>
    %202 = vector.broadcast %190 : vector<1x96xf32> to vector<16x96xf32>
    %203 = arith.addf %201, %202 : vector<16x96xf32>
    %204 = vector.extract_strided_slice %203 {offsets = [0, 0], sizes = [16, 16], strides = [1, 1]} : vector<16x96xf32> to vector<16x16xf32>
    %205 = vector.extract_strided_slice %203 {offsets = [0, 32], sizes = [16, 16], strides = [1, 1]} : vector<16x96xf32> to vector<16x16xf32>
    %206 = vector.extract_strided_slice %203 {offsets = [0, 64], sizes = [16, 16], strides = [1, 1]} : vector<16x96xf32> to vector<16x16xf32>
    %cst_65 = arith.constant dense<0.000000e+00> : vector<16x16xf32>
    %207 = tpu.matmul %204, %205, %cst_65 {dimension_numbers = #tpu.dot_dimension_numbers<[1], [1], [0], [0], [0, 0, 1, 0], [], []>} : vector<16x16xf32>, vector<16x16xf32>, vector<16x16xf32> -> vector<16x16xf32>
    %cst_66 = arith.constant 2.500000e-01 : f32
    %208 = vector.broadcast %cst_66 : f32 to vector<16x16xf32>
    %209 = arith.mulf %207, %208 : vector<16x16xf32>
    %210 = arith.addf %209, %67 : vector<16x16xf32>
    %cst_67 = arith.constant dense<0xFF800000> : vector<16xf32>
    %211 = vector.multi_reduction <maximumf>, %210, %cst_67 [1] : vector<16x16xf32> to vector<16xf32>
    %212 = vector.shape_cast %211 : vector<16xf32> to vector<16x1xf32>
    %213 = vector.broadcast %212 : vector<16x1xf32> to vector<16x16xf32>
    %214 = arith.subf %210, %213 : vector<16x16xf32>
    %215 = math.exp %214 : vector<16x16xf32>
    %cst_68 = arith.constant dense<0.000000e+00> : vector<16xf32>
    %216 = vector.multi_reduction <add>, %215, %cst_68 [1] : vector<16x16xf32> to vector<16xf32>
    %217 = vector.shape_cast %216 : vector<16xf32> to vector<16x1xf32>
    %218 = vector.broadcast %217 : vector<16x1xf32> to vector<16x16xf32>
    %219 = arith.divf %215, %218 : vector<16x16xf32>
    %cst_69 = arith.constant dense<0.000000e+00> : vector<16x16xf32>
    %220 = tpu.matmul %219, %206, %cst_69 {dimension_numbers = #tpu.dot_dimension_numbers<[1], [0], [0], [1], [0, 0, 1, 1], [], []>} : vector<16x16xf32>, vector<16x16xf32>, vector<16x16xf32> -> vector<16x16xf32>
    %221 = vector.extract_strided_slice %203 {offsets = [0, 16], sizes = [16, 16], strides = [1, 1]} : vector<16x96xf32> to vector<16x16xf32>
    %222 = vector.extract_strided_slice %203 {offsets = [0, 48], sizes = [16, 16], strides = [1, 1]} : vector<16x96xf32> to vector<16x16xf32>
    %223 = vector.extract_strided_slice %203 {offsets = [0, 80], sizes = [16, 16], strides = [1, 1]} : vector<16x96xf32> to vector<16x16xf32>
    %cst_70 = arith.constant dense<0.000000e+00> : vector<16x16xf32>
    %224 = tpu.matmul %221, %222, %cst_70 {dimension_numbers = #tpu.dot_dimension_numbers<[1], [1], [0], [0], [0, 0, 1, 0], [], []>} : vector<16x16xf32>, vector<16x16xf32>, vector<16x16xf32> -> vector<16x16xf32>
    %cst_71 = arith.constant 2.500000e-01 : f32
    %225 = vector.broadcast %cst_71 : f32 to vector<16x16xf32>
    %226 = arith.mulf %224, %225 : vector<16x16xf32>
    %227 = arith.addf %226, %67 : vector<16x16xf32>
    %cst_72 = arith.constant dense<0xFF800000> : vector<16xf32>
    %228 = vector.multi_reduction <maximumf>, %227, %cst_72 [1] : vector<16x16xf32> to vector<16xf32>
    %229 = vector.shape_cast %228 : vector<16xf32> to vector<16x1xf32>
    %230 = vector.broadcast %229 : vector<16x1xf32> to vector<16x16xf32>
    %231 = arith.subf %227, %230 : vector<16x16xf32>
    %232 = math.exp %231 : vector<16x16xf32>
    %cst_73 = arith.constant dense<0.000000e+00> : vector<16xf32>
    %233 = vector.multi_reduction <add>, %232, %cst_73 [1] : vector<16x16xf32> to vector<16xf32>
    %234 = vector.shape_cast %233 : vector<16xf32> to vector<16x1xf32>
    %235 = vector.broadcast %234 : vector<16x1xf32> to vector<16x16xf32>
    %236 = arith.divf %232, %235 : vector<16x16xf32>
    %cst_74 = arith.constant dense<0.000000e+00> : vector<16x16xf32>
    %237 = tpu.matmul %236, %223, %cst_74 {dimension_numbers = #tpu.dot_dimension_numbers<[1], [0], [0], [1], [0, 0, 1, 1], [], []>} : vector<16x16xf32>, vector<16x16xf32>, vector<16x16xf32> -> vector<16x16xf32>
    %238 = tpu.concatenate %220, %237 in 1 : vector<16x16xf32>, vector<16x16xf32> -> vector<16x32xf32>
    %239 = arith.truncf %238 : vector<16x32xf32> to vector<16x32xbf16>
    %c1_75 = arith.constant 1 : index
    %c0_76 = arith.constant 0 : index
    %c0_77 = arith.constant 0 : index
    %240 = vector.load %arg6[%c1_75, %c0_76, %c0_77] : memref<2x32x32xbf16, #tpu.memory_space<vmem>>, vector<1x32x32xbf16>
    %241 = vector.shape_cast %240 : vector<1x32x32xbf16> to vector<32x32xbf16>
    %cst_78 = arith.constant dense<0.000000e+00> : vector<16x32xf32>
    %242 = tpu.matmul %239, %241, %cst_78 {dimension_numbers = #tpu.dot_dimension_numbers<[1], [0], [0], [1], [0, 0, 1, 1], [], []>} : vector<16x32xbf16>, vector<32x32xbf16>, vector<16x32xf32> -> vector<16x32xf32>
    %243 = vector.broadcast %191 : vector<1x32xf32> to vector<16x32xf32>
    %244 = arith.addf %242, %243 : vector<16x32xf32>
    %245 = arith.addf %244, %189 : vector<16x32xf32>
    %cst_79 = arith.constant dense<0.000000e+00> : vector<16xf32>
    %246 = vector.multi_reduction <add>, %245, %cst_79 [1] : vector<16x32xf32> to vector<16xf32>
    %247 = vector.shape_cast %246 : vector<16xf32> to vector<16x1xf32>
    %cst_80 = arith.constant 3.200000e+01 : f32
    %248 = vector.broadcast %cst_80 : f32 to vector<16x1xf32>
    %249 = arith.divf %247, %248 : vector<16x1xf32>
    %250 = vector.broadcast %249 : vector<16x1xf32> to vector<16x32xf32>
    %251 = arith.subf %245, %250 : vector<16x32xf32>
    %252 = arith.mulf %251, %251 : vector<16x32xf32>
    %cst_81 = arith.constant dense<0.000000e+00> : vector<16xf32>
    %253 = vector.multi_reduction <add>, %252, %cst_81 [1] : vector<16x32xf32> to vector<16xf32>
    %254 = vector.shape_cast %253 : vector<16xf32> to vector<16x1xf32>
    %cst_82 = arith.constant 3.200000e+01 : f32
    %255 = vector.broadcast %cst_82 : f32 to vector<16x1xf32>
    %256 = arith.divf %254, %255 : vector<16x1xf32>
    %cst_83 = arith.constant 9.99999996E-13 : f32
    %257 = vector.broadcast %cst_83 : f32 to vector<16x1xf32>
    %258 = arith.addf %256, %257 : vector<16x1xf32>
    %259 = math.rsqrt %258 : vector<16x1xf32>
    %260 = vector.broadcast %259 : vector<16x1xf32> to vector<16x32xf32>
    %261 = arith.mulf %251, %260 : vector<16x32xf32>
    %262 = vector.broadcast %192 : vector<1x32xf32> to vector<16x32xf32>
    %263 = arith.mulf %261, %262 : vector<16x32xf32>
    %264 = vector.broadcast %193 : vector<1x32xf32> to vector<16x32xf32>
    %265 = arith.addf %263, %264 : vector<16x32xf32>
    %266 = arith.truncf %265 : vector<16x32xf32> to vector<16x32xbf16>
    %c1_84 = arith.constant 1 : index
    %c0_85 = arith.constant 0 : index
    %c0_86 = arith.constant 0 : index
    %267 = vector.load %arg7[%c1_84, %c0_85, %c0_86] : memref<2x32x64xbf16, #tpu.memory_space<vmem>>, vector<1x32x64xbf16>
    %268 = vector.shape_cast %267 : vector<1x32x64xbf16> to vector<32x64xbf16>
    %cst_87 = arith.constant dense<0.000000e+00> : vector<16x64xf32>
    %269 = tpu.matmul %266, %268, %cst_87 {dimension_numbers = #tpu.dot_dimension_numbers<[1], [0], [0], [1], [0, 0, 1, 1], [], []>} : vector<16x32xbf16>, vector<32x64xbf16>, vector<16x64xf32> -> vector<16x64xf32>
    %270 = vector.broadcast %194 : vector<1x64xf32> to vector<16x64xf32>
    %271 = arith.addf %269, %270 : vector<16x64xf32>
    %cst_88 = arith.constant 5.000000e-01 : f32
    %272 = vector.broadcast %cst_88 : f32 to vector<16x64xf32>
    %273 = arith.mulf %272, %271 : vector<16x64xf32>
    %cst_89 = arith.constant 4.471500e-02 : f32
    %274 = vector.broadcast %cst_89 : f32 to vector<16x64xf32>
    %275 = arith.mulf %274, %271 : vector<16x64xf32>
    %276 = arith.mulf %275, %271 : vector<16x64xf32>
    %277 = arith.mulf %276, %271 : vector<16x64xf32>
    %278 = arith.addf %271, %277 : vector<16x64xf32>
    %cst_90 = arith.constant 0.797884583 : f32
    %279 = vector.broadcast %cst_90 : f32 to vector<16x64xf32>
    %280 = arith.mulf %279, %278 : vector<16x64xf32>
    %281 = math.tanh %280 : vector<16x64xf32>
    %cst_91 = arith.constant 1.000000e+00 : f32
    %282 = vector.broadcast %cst_91 : f32 to vector<16x64xf32>
    %283 = arith.addf %282, %281 : vector<16x64xf32>
    %284 = arith.mulf %273, %283 : vector<16x64xf32>
    %285 = arith.truncf %284 : vector<16x64xf32> to vector<16x64xbf16>
    %c1_92 = arith.constant 1 : index
    %c0_93 = arith.constant 0 : index
    %c0_94 = arith.constant 0 : index
    %286 = vector.load %arg8[%c1_92, %c0_93, %c0_94] : memref<2x64x32xbf16, #tpu.memory_space<vmem>>, vector<1x64x32xbf16>
    %287 = vector.shape_cast %286 : vector<1x64x32xbf16> to vector<64x32xbf16>
    %cst_95 = arith.constant dense<0.000000e+00> : vector<16x32xf32>
    %288 = tpu.matmul %285, %287, %cst_95 {dimension_numbers = #tpu.dot_dimension_numbers<[1], [0], [0], [1], [0, 0, 1, 1], [], []>} : vector<16x64xbf16>, vector<64x32xbf16>, vector<16x32xf32> -> vector<16x32xf32>
    %289 = vector.broadcast %195 : vector<1x32xf32> to vector<16x32xf32>
    %290 = arith.addf %288, %289 : vector<16x32xf32>
    %291 = arith.addf %290, %265 : vector<16x32xf32>
    %cst_96 = arith.constant dense<0.000000e+00> : vector<16xf32>
    %292 = vector.multi_reduction <add>, %291, %cst_96 [1] : vector<16x32xf32> to vector<16xf32>
    %293 = vector.shape_cast %292 : vector<16xf32> to vector<16x1xf32>
    %cst_97 = arith.constant 3.200000e+01 : f32
    %294 = vector.broadcast %cst_97 : f32 to vector<16x1xf32>
    %295 = arith.divf %293, %294 : vector<16x1xf32>
    %296 = vector.broadcast %295 : vector<16x1xf32> to vector<16x32xf32>
    %297 = arith.subf %291, %296 : vector<16x32xf32>
    %298 = arith.mulf %297, %297 : vector<16x32xf32>
    %cst_98 = arith.constant dense<0.000000e+00> : vector<16xf32>
    %299 = vector.multi_reduction <add>, %298, %cst_98 [1] : vector<16x32xf32> to vector<16xf32>
    %300 = vector.shape_cast %299 : vector<16xf32> to vector<16x1xf32>
    %cst_99 = arith.constant 3.200000e+01 : f32
    %301 = vector.broadcast %cst_99 : f32 to vector<16x1xf32>
    %302 = arith.divf %300, %301 : vector<16x1xf32>
    %cst_100 = arith.constant 9.99999996E-13 : f32
    %303 = vector.broadcast %cst_100 : f32 to vector<16x1xf32>
    %304 = arith.addf %302, %303 : vector<16x1xf32>
    %305 = math.rsqrt %304 : vector<16x1xf32>
    %306 = vector.broadcast %305 : vector<16x1xf32> to vector<16x32xf32>
    %307 = arith.mulf %297, %306 : vector<16x32xf32>
    %308 = vector.broadcast %196 : vector<1x32xf32> to vector<16x32xf32>
    %309 = arith.mulf %307, %308 : vector<16x32xf32>
    %310 = vector.broadcast %197 : vector<1x32xf32> to vector<16x32xf32>
    %311 = arith.addf %309, %310 : vector<16x32xf32>
    %312 = vector.extract_strided_slice %311 {offsets = [0, 0], sizes = [1, 32], strides = [1, 1]} : vector<16x32xf32> to vector<1x32xf32>
    %313 = vector.extract_strided_slice %311 {offsets = [8, 0], sizes = [1, 32], strides = [1, 1]} : vector<16x32xf32> to vector<1x32xf32>
    %314 = tpu.concatenate %312, %313 in 0 : vector<1x32xf32>, vector<1x32xf32> -> vector<2x32xf32>
    %315 = arith.truncf %314 : vector<2x32xf32> to vector<2x32xbf16>
    %c0_101 = arith.constant 0 : index
    %c0_102 = arith.constant 0 : index
    %316 = vector.load %arg9[%c0_101, %c0_102] : memref<32x32xbf16, #tpu.memory_space<vmem>>, vector<32x32xbf16>
    %cst_103 = arith.constant dense<0.000000e+00> : vector<2x32xf32>
    %317 = tpu.matmul %315, %316, %cst_103 {dimension_numbers = #tpu.dot_dimension_numbers<[1], [0], [0], [1], [0, 0, 1, 1], [], []>} : vector<2x32xbf16>, vector<32x32xbf16>, vector<2x32xf32> -> vector<2x32xf32>
    %318 = vector.extract_strided_slice %0 {offsets = [2, 0], sizes = [1, 32], strides = [1, 1]} : vector<24x128xf32> to vector<1x32xf32>
    %319 = vector.broadcast %318 : vector<1x32xf32> to vector<2x32xf32>
    %320 = arith.addf %317, %319 : vector<2x32xf32>
    %321 = math.tanh %320 : vector<2x32xf32>
    %322 = arith.truncf %321 : vector<2x32xf32> to vector<2x32xbf16>
    %c0_104 = arith.constant 0 : index
    %c0_105 = arith.constant 0 : index
    %323 = vector.load %arg10[%c0_104, %c0_105] : memref<32x128xbf16, #tpu.memory_space<vmem>>, vector<32x128xbf16>
    %cst_106 = arith.constant dense<0.000000e+00> : vector<2x128xf32>
    %324 = tpu.matmul %322, %323, %cst_106 {dimension_numbers = #tpu.dot_dimension_numbers<[1], [0], [0], [1], [0, 0, 1, 1], [], []>} : vector<2x32xbf16>, vector<32x128xbf16>, vector<2x128xf32> -> vector<2x128xf32>
    %325 = vector.extract_strided_slice %0 {offsets = [3, 0], sizes = [1, 128], strides = [1, 1]} : vector<24x128xf32> to vector<1x128xf32>
    %326 = vector.broadcast %325 : vector<1x128xf32> to vector<2x128xf32>
    %327 = arith.addf %324, %326 : vector<2x128xf32>
    %c0_107 = arith.constant 0 : index
    %c0_108 = arith.constant 0 : index
    %328 = vector.load %arg11[%c0_107, %c0_108] : memref<2x128xf32, #tpu.memory_space<vmem>>, vector<2x128xf32>
    tpu.vector_store %arg11[%c0_107, %c0_108], %327 {strides = array<i32>} : memref<2x128xf32, #tpu.memory_space<vmem>>, vector<2x128xf32>,
    return
  }
}

</mosaic_0001>

<bundles_post_ra>
// kernel: bert_sentiment_forward.1
= control target key start
LH: loop header
LB: loop body
LE: loop exit
PB: predicated region body
PF: predicated region fallthrough
CT: control target
= control target key end

     0   :  { %v2441_v1 = vmov 0   ;;  %vm80_vm0 = vcmask 1043456   ;;  %v2442_v6 = vmov 0.0   ;;  %s2932_s0 = inlined_call_operand.vmem [shape: s32[16,1], index: 0, kind: input, shape index: {}]   ;;  %s2933_s1 = inlined_call_operand.vmem [shape: f32[1,16], index: 1, kind: input, shape index: {}]   ;;  %s2934_s2 = inlined_call_operand.vmem [shape: f32[100,32], index: 2, kind: input, shape index: {}]   ;;  %s2935_s3 = inlined_call_operand.vmem [shape: f32[16,32], index: 3, kind: input, shape index: {}]   ;;  %s2936_s4 = inlined_call_operand.vmem [shape: f32[24,128], index: 4, kind: input, shape index: {}]   ;;  %s2937_s5 = inlined_call_operand.vmem [shape: bf16[2,32,96], index: 5, kind: input, shape index: {}]   ;;  %s2938_s6 = inlined_call_operand.vmem [shape: bf16[2,32,32], index: 6, kind: input, shape index: {}]   ;;  %s2939_s7 = inlined_call_operand.vmem [shape: bf16[2,32,64], index: 7, kind: input, shape index: {}]   ;;  %s2940_s8 = inlined_call_operand.vmem [shape: bf16[2,64,32], index: 8, kind: input, shape index: {}]   ;;  %s2941_s9 = inlined_call_operand.vmem [shape: bf16[32,32], index: 9, kind: input, shape index: {}]   ;;  %s2942_s10 = inlined_call_operand.vmem [shape: bf16[32,128], index: 10, kind: input, shape index: {}]   ;;  %s2943_s11 = inlined_call_operand.hbm [shape: f32[2,128], index: 11, kind: output, shape index: {}]  }
   0x1   :  { %v43_v0 = vld [vmem:[%s2932_s0] sm:$0xff]  ;;  %2321 = vset.pattern.permute.xlu0 %v2441_v1  ;;  %v70_v3 = vld [vmem:[%s2934_s2 + $0x58] sm:$0xff]  ;;  %v44_v4 = vld [vmem:[%s2932_s0 + $0x8] sm:$0xff]  ;;  %2166 = vmatprep.subr.bf16.mxu1 %v2442_v6 }
   0x2   :  { %v71_v2 = vld [vmem:[%s2934_s2 + $0x60] sm:$0xf]  ;;  %48 = vperm.xlu0 %2321, %v43_v0   ;;  %v69_v5 = vld [vmem:[%s2934_s2 + $0x50] sm:$0xff]  ;;  %v68_v7 = vld [vmem:[%s2934_s2 + $0x48] sm:$0xff] }
   0x3   :  { %2137 = vmatprep.subr.msk.mxu0 %vm80_vm0, %v71_v2  ;;  %v67_v8 = vld [vmem:[%s2934_s2 + $0x40] sm:$0xff]  ;;  %v66_v9 = vld [vmem:[%s2934_s2 + $0x38] sm:$0xff]  ;;  %v65_v10 = vld [vmem:[%s2934_s2 + $0x30] sm:$0xff] }
   0x4   :  { %2138 = vmatpush3.msk.msra.mxu0 %vm80_vm0, %v71_v2  ;;  %v64_v11 = vld [vmem:[%s2934_s2 + $0x28] sm:$0xff]  ;;  %v63_v12 = vld [vmem:[%s2934_s2 + $0x20] sm:$0xff]  ;;  %v62_v13 = vld [vmem:[%s2934_s2 + $0x18] sm:$0xff] }
   0x5   :  { %2139 = vmatprep.subr.mxu0 %v70_v3  ;;  %v61_v14 = vld [vmem:[%s2934_s2 + $0x10] sm:$0xff]  ;;  %v60_v15 = vld [vmem:[%s2934_s2 + $0x8] sm:$0xff]  ;;  %v59_v16 = vld [vmem:[%s2934_s2] sm:$0xff] }
   0x6   :  { %2140 = vmatpush3.msra.mxu0 %v70_v3  ;;  %51 = vperm.xlu0 %2321, %v44_v4  }
   0x7   :  { %2141 = vmatprep.subr.mxu0 %v69_v5 }
   0x8   :  { %2142 = vmatpush3.msra.mxu0 %v69_v5 }
   0x9   :  { %2143 = vmatprep.subr.mxu0 %v68_v7 }
   0xa   :  { %2144 = vmatpush3.msra.mxu0 %v68_v7 }
   0xb   :  { %2145 = vmatprep.subr.mxu0 %v67_v8 }
   0xc   :  { %2146 = vmatpush3.msra.mxu0 %v67_v8 }
   0xd   :  { %2147 = vmatprep.subr.mxu0 %v66_v9 }
   0xe   :  { %2148 = vmatpush3.msra.mxu0 %v66_v9 }
   0xf   :  { %2149 = vmatprep.subr.mxu0 %v65_v10 }
  0x10   :  { %2150 = vmatpush3.msra.mxu0 %v65_v10 }
  0x11   :  { %2151 = vmatprep.subr.mxu0 %v64_v11 }
  0x12   :  { %2152 = vmatpush3.msra.mxu0 %v64_v11 }
  0x13   :  { %2153 = vmatprep.subr.mxu0 %v63_v12 }
  0x14   :  { %2154 = vmatpush3.msra.mxu0 %v63_v12 }
  0x15   :  { %2155 = vmatprep.subr.mxu0 %v62_v13 }
  0x16   :  { %2156 = vmatpush3.msra.mxu0 %v62_v13 }
  0x17   :  { %2157 = vmatprep.subr.mxu0 %v61_v14 }
  0x18   :  { %2158 = vmatpush3.msra.mxu0 %v61_v14 }
  0x19   :  { %16 = vsyncpa [#allocation3], 0  ;;  %2159 = vmatprep.subr.mxu0 %v60_v15  ;;  %v45_v17 = vlaneseq  ;;  %vm73_vm1 = vcmask 818176   ;;  %v72_v24 = vld [vmem:[%s2935_s3] sm:$0xff]  ;;  %vm159_vm4 = vcmask 261120   ;;  %v2332_v40 = vld [vmem:[%s2937_s5 + $0x8] sm:$0xff]  }
  0x1a   :  { %2160 = vmatpush3.msra.mxu0 %v60_v15  ;;  %vm2443_vm5 = vmmov 0   ;;  %2167 = vmatpush3.bf16.msra.mxu1 %v2332_v40  ;;  %v2333_v41 = vld [vmem:[%s2937_s5] sm:$0xff]   ;;  %vm309_vm6 = vcmask 130048   ;;  %s2444_s13 = smov 96   ;;  %v2445_v14 = vmov -10000.0   ;;  %s2447_s16 = smov 80  }
  0x1b   :  { %2161 = vmatprep.subr.mxu0 %v59_v16  ;;  %v2559_v18 = vand.u32 127, %v45_v17  ;;  %2170 = vmatprep.mubr.msk.bf16.mxu1 %vm2443_vm5, %v2442_v6  ;;  %v2581_v48 = vshrl.u32 %v45_v17, 7  ;;  %v2589_v50 = vld [vmem:[%s2936_s4] sm:$0xff]  ;;  %s2448_s17 = smov 112   ;;  %s2449_s18 = smov 48   ;;  %vm945_vm15 = vcmask 523264  }
  0x1c   :  { %2162 = vmatpush3.msra.mxu0 %v59_v16  ;;  %2168 = vmatprep.subr.bf16.mxu1 %v2442_v6  ;;  %v226_v11 = vld [vmem:[%s2933_s1] sm:$0x1]  ;;  %s2446_s1 = smov 64   ;;  %s2450_s23 = smov 16   ;;  %vm1827_vm0 = vcmask 1040384  }
  0x1d   :  { %v2584_v49 = vsub.s32 0, %v2581_v48  ;;  %v2594_v54 = vsub.s32 1, %v2581_v48  ;;  %v245_v63 = vsub.s32 4, %v2581_v48  ;;  %vm227_vm7 = vcmp.gt.f32.partialorder %v226_v11, 0.5 }
  0x1e   :  { %2169 = vmatpush3.bf16.msra.mxu1 %v2333_v41  ;;  %v228_v12 = vsel %vm227_vm7, 1, %v2441_v1  ;;  %vm219_vm8 = vcmp.ge.s32.totalorder %v2559_v18, 8  ;;  %vm220_vm9 = vcmp.lt.s32.totalorder %v2559_v18, 16  ;;  %vm209_vm12 = vcmp.lt.s32.totalorder %v2559_v18, 8 }
  0x1f   :  { %v190_v53 = vrot.slane %v2589_v50, %v2584_v49  ;;  %v196_v58 = vrot.slane %v2589_v50, %v2594_v54  ;;  %v246_v0 = vrot.slane %v2589_v50, %v245_v63  ;;  %v232_v13 = vrot.slane %v228_v12, %v2584_v49  ;;  %vm221_vm10 = vmand %vm219_vm8, %vm220_vm9 }
  0x21   :  { %vm233_vm11 = vcmp.eq.s32.totalorder %v232_v13, 1 }
  0x22   :  { %vm235_vm13 = vmand %vm221_vm10, %vm233_vm11 }
  0x23   :  { %vm234_vm14 = vmand %vm209_vm12, %vm233_vm11  ;;  %v2633_v15 = vsel %vm235_vm13, 0.0, %v2445_v14 }
  0x7d   :  { %v49_v19 = vpop.permute.xlu0 %48 }
  0x7e   :  { %vm53_vm2 = vcmp.eq.s32.totalorder %v2559_v18, %v49_v19  ;;  %v2635_v19 = vsel %vm234_vm14, 0.0, %v2445_v14 }
  0x7f   :  { %v1973_v20 = vsel %vm53_vm2, 1.0, %v2442_v6 }
  0x80   :  { %2163 = vmatprep.mubr.msk.f32.mxu0 %vm73_vm1, %v1973_v20 }
  0x81   :  { %v52_v21 = vpop.permute.xlu0 %51 }
  0x82   :  { %vm54_vm3 = vcmp.eq.s32.totalorder %v2559_v18, %v52_v21 }
  0x83   :  { %v1974_v22 = vsel %vm54_vm3, 1.0, %v2442_v6 }
  0x84   :  { %2164 = vmatmul.mubr.msk.f32.vlgmr.msra.gmra.mxu0 %vm73_vm1, %v1974_v22 }
 0x144   :  { %v2165_v23 = vpop.f32.mrf.mxu0 }
 0x145   :  { %v156_v27 = vadd.f32 %v2165_v23, %v72_v24 }
 0x146   :  { %v150_v25 = vpop.f32.mrf.mxu0 }
 0x147   :  { %v151_v26 = vadd.f32 %v150_v25, %v72_v24  ;;  %v163_v29 = vsel %vm159_vm4, %v156_v27, 0.0 }
 0x149   :  { %v160_v28 = vsel %vm159_vm4, %v151_v26, 0.0 }
 0x14a   :  { %161 = vadd.xlane.f32.xlu1 %v160_v28 }
 0x14e   :  { %164 = vadd.xlane.f32.xlu1 %v163_v29 }
 0x1d3   :  { %v162_v30 = vpop.xlane.xlu1 %161 }
 0x1d4   :  { %v167_v31 = vmul.f32 0.03125, %v162_v30 }
 0x1d6   :  { %v169_v32 = vsub.f32 %v151_v26, %v167_v31 }
 0x1d7   :  { %v165_v33 = vpop.xlane.xlu1 %164 }
 0x1d8   :  { %v168_v34 = vmul.f32 0.03125, %v165_v33  ;;  %v171_v35 = vmul.f32 %v169_v32, %v169_v32 }
 0x1da   :  { %v170_v36 = vsub.f32 %v156_v27, %v168_v34  ;;  %v173_v37 = vsel %vm159_vm4, %v171_v35, 0.0 }
 0x1db   :  { %174 = vadd.xlane.f32.xlu0 %v173_v37 }
 0x1dc   :  { %v172_v38 = vmul.f32 %v170_v36, %v170_v36 }
 0x1de   :  { %v176_v39 = vsel %vm159_vm4, %v172_v38, 0.0 }
 0x1df   :  { %177 = vadd.xlane.f32.xlu1 %v176_v39 }
 0x264   :  { %v175_v42 = vpop.xlane.xlu0 %174 }
 0x265   :  { %v179_v43 = vmul.f32 0.03125, %v175_v42 }
 0x267   :  { %v181_v44 = vadd.f32 1e-12, %v179_v43 }
 0x268   :  { %v178_v45 = vpop.xlane.xlu1 %177 }
 0x269   :  { %2356 = vrsqrt.f32 %v181_v44  ;;  %v180_v46 = vmul.f32 0.03125, %v178_v45 }
 0x26b   :  { %v182_v47 = vadd.f32 1e-12, %v180_v46 }
 0x26d   :  { %2358 = vrsqrt.f32 %v182_v47 }
 0x276   :  { %v2357_v51 = vpop.eup %2356 }
 0x277   :  { %v185_v52 = vmul.f32 %v2357_v51, %v169_v32 }
 0x279   :  { %v191_v57 = vmul.f32 %v190_v53, %v185_v52 }
 0x27a   :  { %v2359_v55 = vpop.eup %2358 }
 0x27b   :  { %v186_v56 = vmul.f32 %v2359_v55, %v170_v36  ;;  %v2598_v60 = vadd.f32 %v196_v58, %v191_v57 }
 0x27d   :  { %v192_v59 = vmul.f32 %v190_v53, %v186_v56 }
 0x27f   :  { %v2600_v61 = vadd.f32 %v196_v58, %v192_v59 }
 0x281   :  { %v238_v62 = vpack.c.bf16 %v2600_v61, %v2598_v60 }
 0x283   :  { %2171 = vmatmul.mubr.msk.bf16.vlgmr.msra.gmra.mxu1 %vm159_vm4, %v238_v62 }
 0x343   :  { %v296_v2 = vpop.f32.mrf.mxu1 }
 0x344   :  { %v2609_v3 = vadd.f32 %v296_v2, %v246_v0 }
 0x345   :  { %v2172_v4 = vpop.f32.mrf.mxu1 }
 0x346   :  { %2178 = vmatprep.mubr.msk.f32.mxu1 %vm309_vm6, %v2609_v3 }
 0x347   :  { %v299_v5 = vpop.f32.mrf.mxu1 }
 0x348   :  { %v2613_v7 = vadd.f32 %v299_v5, %v246_v0 }
 0x349   :  { %v2173_v8 = vpop.f32.mrf.mxu1 }
 0x34a   :  { %307 = vrot.lane.b32.xlu1 %v2613_v7, %s2444_s13 }
 0x34e   :  { %305 = vrot.lane.b32.xlu1 %v2609_v3, %s2444_s13 }
 0x3bc   :  { %v308_v9 = vpop.permute.xlu1 %307 }
 0x3bd   :  { %2174 = vmatprep.subr.msk.mxu1 %vm309_vm6, %v308_v9 }
 0x3be   :  { %2175 = vmatpush3.xpose.msk.msra.mxu1 %vm309_vm6, %v308_v9 }
 0x3c0   :  { %v306_v10 = vpop.permute.xlu1 %305 }
 0x3c1   :  { %2176 = vmatprep.subr.msk.mxu1 %vm309_vm6, %v306_v10 }
 0x3c2   :  { %2177 = vmatpush3.xpose.msk.msra.mxu1 %vm309_vm6, %v306_v10 }
 0x3c5   :  { %2179 = vmatmul.mubr.msk.f32.vlgmr.msra.gmra.mxu1 %vm309_vm6, %v2613_v7 }
 0x485   :  { %v2180_v16 = vpop.f32.mrf.mxu1 }
 0x486   :  { %v394_v17 = vmul.f32 0.25, %v2180_v16 }
 0x487   :  { %v384_v1 = vpop.f32.mrf.mxu1 }
 0x488   :  { %v393_v20 = vmul.f32 0.25, %v384_v1  ;;  %v396_v21 = vadd.f32 %v394_v17, %v2633_v15 }
 0x48a   :  { %v400_v22 = vsel %vm309_vm6, %v396_v21, -inf  ;;  %v395_v23 = vadd.f32 %v393_v20, %v2635_v19 }
 0x48b   :  { %401 = vmax.xlane.f32.xlu0 %v400_v22 }
 0x48c   :  { %v397_v18 = vsel %vm309_vm6, %v395_v23, -inf }
 0x48d   :  { %398 = vmax.xlane.f32.xlu1 %v397_v18 }
 0x49e   :  { %419 = vrot.lane.b32.xlu1 %v2609_v3, %s2446_s1 }
 0x4a1   :  { %421 = vrot.lane.b32.xlu0 %v2613_v7, %s2446_s1 }
 0x4a5   :  { %512 = vrot.lane.b32.xlu0 %v2613_v7, %s2447_s16 }
 0x514   :  { %v402_v24 = vpop.xlane.xlu0 %401 }
 0x515   :  { %v404_v25 = vsub.f32 %v396_v21, %v402_v24 }
 0x516   :  { %v399_v26 = vpop.xlane.xlu1 %398 }
 0x517   :  { %v407_v27 = vmul.f32 1.442695, %v404_v25  ;;  %v403_v28 = vsub.f32 %v395_v23, %v399_v26 }
 0x518   :  { %v422_v29 = vpop.permute.xlu0 %421 }
 0x519   :  { %2360 = vpow2.f32 %v407_v27  ;;  %v405_v30 = vmul.f32 1.442695, %v403_v28  ;;  %2181 = vmatprep.subr.mxu1 %v422_v29 }
 0x51a   :  { %2182 = vmatpush3.msra.mxu1 %v422_v29  ;;  %v420_v31 = vpop.permute.xlu1 %419 }
 0x51b   :  { %2362 = vpow2.f32 %v405_v30  ;;  %2183 = vmatprep.subr.mxu1 %v420_v31 }
 0x51c   :  { %v513_v32 = vpop.permute.xlu0 %512  ;;  %2184 = vmatpush3.msra.mxu1 %v420_v31  ;;  %v727_v31 = vsub.s32 5, %v2581_v48 }
 0x51d   :  { %2188 = vmatprep.subr.msk.mxu1 %vm309_vm6, %v513_v32 }
 0x526   :  { %v2361_v33 = vpop.eup %2360 }
 0x527   :  { %v412_v34 = vsel %vm309_vm6, %v2361_v33, 0.0 }
 0x528   :  { %v2363_v35 = vpop.eup %2362  ;;  %413 = vadd.xlane.f32.xlu0 %v412_v34 }
 0x529   :  { %v409_v36 = vsel %vm309_vm6, %v2363_v35, 0.0 }
 0x52c   :  { %410 = vadd.xlane.f32.xlu0 %v409_v36 }
 0x542   :  { %510 = vrot.lane.b32.xlu0 %v2609_v3, %s2447_s16 }
 0x546   :  { %506 = vrot.lane.b32.xlu0 %v2609_v3, %s2448_s17 }
 0x54a   :  { %508 = vrot.lane.b32.xlu0 %v2613_v7, %s2448_s17 }
 0x5b1   :  { %v414_v37 = vpop.xlane.xlu0 %413 }
 0x5b2   :  { %2364 = vrcp.f32 %v414_v37 }
 0x5b5   :  { %v411_v38 = vpop.xlane.xlu0 %410 }
 0x5b6   :  { %2366 = vrcp.f32 %v411_v38 }
 0x5b9   :  { %v511_v39 = vpop.permute.xlu0 %510 }
 0x5bd   :  { %v507_v44 = vpop.permute.xlu0 %506 }
 0x5bf   :  { %v2365_v40 = vpop.eup %2364 }
 0x5c0   :  { %v418_v43 = vmul.f32 %v2365_v40, %v2361_v33 }
 0x5c1   :  { %v509_v45 = vpop.permute.xlu0 %508 }
 0x5c3   :  { %v2367_v41 = vpop.eup %2366 }
 0x5c4   :  { %v416_v42 = vmul.f32 %v2367_v41, %v2363_v35 }
 0x5c6   :  { %2185 = vmatprep.mubr.msk.f32.mxu1 %vm309_vm6, %v416_v42 }
 0x5c7   :  { %2186 = vmatmul.mubr.msk.f32.vlgmr.msra.gmra.mxu1 %vm309_vm6, %v418_v43 }
 0x5c8   :  { %2189 = vmatpush3.xpose.msk.msra.mxu1 %vm309_vm6, %v513_v32  ;;  %2192 = vmatprep.mubr.msk.f32.mxu1 %vm309_vm6, %v507_v44  ;;  %v728_v32 = vrot.slane %v2589_v50, %v727_v31 }
 0x5c9   :  { %2190 = vmatprep.subr.msk.mxu1 %vm309_vm6, %v511_v39 }
 0x5cc   :  { %2191 = vmatpush3.xpose.msk.msra.mxu1 %vm309_vm6, %v511_v39 }
 0x5cd   :  { %2202 = vmatprep.subr.bf16.mxu1 %v2442_v6 }
 0x5cf   :  { %2193 = vmatmul.mubr.msk.f32.vlgmr.msra.gmra.mxu1 %vm309_vm6, %v509_v45 }
 0x5d0   :  { %2206 = vmatprep.mubr.msk.bf16.mxu1 %vm2443_vm5, %v2442_v6 }
 0x687   :  { %v2187_v46 = vpop.f32.mrf.mxu1 }
 0x689   :  { %v497_v47 = vpop.f32.mrf.mxu1 }
 0x68f   :  { %v2194_v51 = vpop.f32.mrf.mxu1 }
 0x690   :  { %v598_v52 = vmul.f32 0.25, %v2194_v51 }
 0x691   :  { %v588_v53 = vpop.f32.mrf.mxu1 }
 0x692   :  { %v597_v55 = vmul.f32 0.25, %v588_v53  ;;  %v600_v56 = vadd.f32 %v598_v52, %v2633_v15 }
 0x694   :  { %v604_v57 = vsel %vm309_vm6, %v600_v56, -inf  ;;  %v599_v58 = vadd.f32 %v597_v55, %v2635_v19 }
 0x695   :  { %605 = vmax.xlane.f32.xlu0 %v604_v57 }
 0x696   :  { %v601_v59 = vsel %vm309_vm6, %v599_v58, -inf }
 0x697   :  { %602 = vmax.xlane.f32.xlu1 %v601_v59 }
 0x71e   :  { %v606_v62 = vpop.xlane.xlu0 %605 }
 0x71f   :  { %v608_v0 = vsub.f32 %v600_v56, %v606_v62  ;;  %v2337_v56 = vld [vmem:[%s2939_s7] sm:$0xff]  }
 0x720   :  { %v603_v2 = vpop.xlane.xlu1 %602 }
 0x721   :  { %v611_v4 = vmul.f32 1.442695, %v608_v0  ;;  %v607_v5 = vsub.f32 %v599_v58, %v603_v2 }
 0x723   :  { %2368 = vpow2.f32 %v611_v4  ;;  %v609_v8 = vmul.f32 1.442695, %v607_v5  ;;  %v815_v4 = vsub.s32 6, %v2581_v48 }
 0x725   :  { %2370 = vpow2.f32 %v609_v8 }
 0x730   :  { %v2369_v9 = vpop.eup %2368 }
 0x731   :  { %v616_v10 = vsel %vm309_vm6, %v2369_v9, 0.0 }
 0x732   :  { %v2371_v11 = vpop.eup %2370  ;;  %617 = vadd.xlane.f32.xlu1 %v616_v10  ;;  %v821_v10 = vsub.s32 7, %v2581_v48 }
 0x733   :  { %v613_v12 = vsel %vm309_vm6, %v2371_v11, 0.0 }
 0x734   :  { %614 = vadd.xlane.f32.xlu0 %v613_v12 }
 0x743   :  { %623 = vrot.lane.b32.xlu1 %v2609_v3, %s2449_s18  ;;  %v2334_v3 = vld [vmem:[%s2938_s6 + $0x8] sm:$0xff]  }
 0x744   :  { %2203 = vmatpush3.bf16.msra.mxu1 %v2334_v3  ;;  %v2341_v3 = vld [vmem:[%s2940_s8] sm:$0xff]  }
 0x745   :  { %2204 = vmatprep.subr.bf16.mxu1 %v2442_v6 }
 0x74a   :  { %625 = vrot.lane.b32.xlu0 %v2613_v7, %s2449_s18  ;;  %v2335_v7 = vld [vmem:[%s2938_s6] sm:$0xff]  }
 0x74b   :  { %2205 = vmatpush3.bf16.msra.mxu1 %v2335_v7  ;;  %v2742_v7 = vld [vmem:[%s2936_s4 + $0x8] sm:$0xff] }
 0x74c   :  { %2218 = vmatprep.subr.bf16.mxu1 %v2442_v6 }
 0x7bb   :  { %v618_v13 = vpop.xlane.xlu1 %617 }
 0x7bc   :  { %2372 = vrcp.f32 %v618_v13 }
 0x7bd   :  { %v615_v14 = vpop.xlane.xlu0 %614 }
 0x7be   :  { %2374 = vrcp.f32 %v615_v14  ;;  %v822_v14 = vrot.slane %v2589_v50, %v821_v10 }
 0x7bf   :  { %v624_v17 = vpop.permute.xlu1 %623 }
 0x7c1   :  { %v626_v16 = vpop.permute.xlu0 %625 }
 0x7c2   :  { %2195 = vmatprep.subr.mxu0 %v626_v16 }
 0x7c3   :  { %2196 = vmatpush3.msra.mxu0 %v626_v16 }
 0x7c4   :  { %2197 = vmatprep.subr.mxu0 %v624_v17 }
 0x7c5   :  { %2198 = vmatpush3.msra.mxu0 %v624_v17 }
 0x7c6   :  { %2210 = vmatprep.subr.bf16.mxu0 %v2442_v6 }
 0x7c9   :  { %v2373_v1 = vpop.eup %2372 }
 0x7ca   :  { %v622_v22 = vmul.f32 %v2373_v1, %v2369_v9  ;;  %v816_v9 = vrot.slane %v2589_v50, %v815_v4  ;;  %v2340_v50 = vld [vmem:[%s2940_s8 + $0x8] sm:$0xff]  }
 0x7cb   :  { %v2375_v20 = vpop.eup %2374 }
 0x7cc   :  { %v620_v21 = vmul.f32 %v2375_v20, %v2371_v11 }
 0x7ce   :  { %2199 = vmatprep.mubr.msk.f32.mxu0 %vm309_vm6, %v620_v21  ;;  %v2338_v21 = vld [vmem:[%s2940_s8 + $0x18] sm:$0xff]  }
 0x7cf   :  { %2200 = vmatmul.mubr.msk.f32.vlgmr.msra.gmra.mxu0 %vm309_vm6, %v622_v22  ;;  %v2339_v22 = vld [vmem:[%s2940_s8 + $0x10] sm:$0xff]  }
 0x7d0   :  { %2214 = vmatprep.mubr.msk.bf16.mxu0 %vm2443_vm5, %v2442_v6 }
 0x88f   :  { %v2201_v23 = vpop.f32.mrf.mxu0 }
 0x891   :  { %v701_v18 = vpop.f32.mrf.mxu0 }
 0x892   :  { %v2322_v24 = vpack.i.bf16 %v2201_v23, %v701_v18  ;;  %v833_v23 = vrot.slane %v2742_v7, %v2584_v49 }
 0x894   :  { %2323 = vrot.lane.b32.xlu1 %v2322_v24, %s2450_s23 }
 0x906   :  { %v2324_v25 = vpop.permute.xlu1 %2323 }
 0x907   :  { %v2326_v26 = vunpack.i.h.bf16 %v2324_v25  ;;  %v2325_v27 = vunpack.i.l.bf16 %v2324_v25 }
 0x909   :  { %v719_v28 = vsel %vm309_vm6, %v2187_v46, %v2326_v26  ;;  %v718_v29 = vsel %vm309_vm6, %v497_v47, %v2325_v27 }
 0x90a   :  { %v720_v30 = vpack.c.bf16 %v719_v28, %v718_v29 }
 0x90c   :  { %2207 = vmatmul.mubr.msk.bf16.vlgmr.msra.gmra.mxu1 %vm159_vm4, %v720_v30 }
 0x90d   :  { %2226 = vmatprep.mubr.msk.bf16.mxu1 %vm2443_vm5, %v2442_v6  ;;  %2219 = vmatpush3.bf16.msra.mxu1 %v2338_v21 }
 0x90e   :  { %2220 = vmatprep.subr.bf16.mxu1 %v2442_v6 }
 0x911   :  { %2221 = vmatpush3.bf16.msra.mxu1 %v2339_v22 }
 0x912   :  { %2222 = vmatprep.subr.bf16.mxu1 %v2442_v6 }
 0x915   :  { %2223 = vmatpush3.bf16.msra.mxu1 %v2340_v50 }
 0x916   :  { %2224 = vmatprep.subr.bf16.mxu1 %v2442_v6 }
 0x919   :  { %2225 = vmatpush3.bf16.msra.mxu1 %v2341_v3 }
 0x9cc   :  { %v778_v33 = vpop.f32.mrf.mxu1 }
 0x9cd   :  { %v779_v34 = vadd.f32 %v778_v33, %v728_v32 }
 0x9ce   :  { %v2208_v35 = vpop.f32.mrf.mxu1 }
 0x9cf   :  { %v785_v36 = vadd.f32 %v779_v34, %v2598_v60 }
 0x9d0   :  { %v781_v37 = vpop.f32.mrf.mxu1 }
 0x9d1   :  { %v782_v38 = vadd.f32 %v781_v37, %v728_v32  ;;  %v787_v39 = vsel %vm159_vm4, %v785_v36, 0.0 }
 0x9d2   :  { %788 = vadd.xlane.f32.xlu0 %v787_v39  ;;  %v2209_v40 = vpop.f32.mrf.mxu1 }
 0x9d3   :  { %v786_v41 = vadd.f32 %v782_v38, %v2600_v61  ;;  %v2336_v61 = vld [vmem:[%s2939_s7 + $0x8] sm:$0xff]  }
 0x9d4   :  { %2211 = vmatpush3.bf16.msra.mxu0 %v2336_v61 }
 0x9d5   :  { %v790_v42 = vsel %vm159_vm4, %v786_v41, 0.0  ;;  %2212 = vmatprep.subr.bf16.mxu0 %v2442_v6 }
 0x9d6   :  { %791 = vadd.xlane.f32.xlu1 %v790_v42 }
 0x9d8   :  { %2213 = vmatpush3.bf16.msra.mxu0 %v2337_v56 }
 0x9d9   :  { %2230 = vmatprep.subr.bf16.mxu0 %v2442_v6 }
 0xa5b   :  { %v789_v43 = vpop.xlane.xlu0 %788 }
 0xa5c   :  { %v793_v44 = vmul.f32 0.03125, %v789_v43 }
 0xa5e   :  { %v795_v45 = vsub.f32 %v785_v36, %v793_v44 }
 0xa5f   :  { %v792_v46 = vpop.xlane.xlu1 %791 }
 0xa60   :  { %v794_v47 = vmul.f32 0.03125, %v792_v46  ;;  %v797_v51 = vmul.f32 %v795_v45, %v795_v45 }
 0xa62   :  { %v796_v52 = vsub.f32 %v786_v41, %v794_v47  ;;  %v799_v60 = vsel %vm159_vm4, %v797_v51, 0.0 }
 0xa63   :  { %800 = vadd.xlane.f32.xlu0 %v799_v60 }
 0xa64   :  { %v798_v53 = vmul.f32 %v796_v52, %v796_v52 }
 0xa66   :  { %v802_v55 = vsel %vm159_vm4, %v798_v53, 0.0 }
 0xa67   :  { %803 = vadd.xlane.f32.xlu0 %v802_v55 }
 0xaec   :  { %v801_v57 = vpop.xlane.xlu0 %800 }
 0xaed   :  { %v805_v58 = vmul.f32 0.03125, %v801_v57 }
 0xaef   :  { %v807_v59 = vadd.f32 1e-12, %v805_v58 }
 0xaf0   :  { %v804_v62 = vpop.xlane.xlu0 %803 }
 0xaf1   :  { %2376 = vrsqrt.f32 %v807_v59  ;;  %v806_v0 = vmul.f32 0.03125, %v804_v62 }
 0xaf3   :  { %v808_v2 = vadd.f32 1e-12, %v806_v0 }
 0xaf5   :  { %2378 = vrsqrt.f32 %v808_v2 }
 0xafe   :  { %v2377_v5 = vpop.eup %2376 }
 0xaff   :  { %v811_v8 = vmul.f32 %v2377_v5, %v795_v45 }
 0xb01   :  { %v817_v13 = vmul.f32 %v816_v9, %v811_v8 }
 0xb02   :  { %v2379_v11 = vpop.eup %2378 }
 0xb03   :  { %v812_v12 = vmul.f32 %v2379_v11, %v796_v52  ;;  %v823_v17 = vadd.f32 %v822_v14, %v817_v13  ;;  %v920_v52 = vrot.slane %v2742_v7, %v2594_v54 }
 0xb05   :  { %v818_v16 = vmul.f32 %v816_v9, %v812_v12 }
 0xb07   :  { %v824_v1 = vadd.f32 %v822_v14, %v818_v16 }
 0xb09   :  { %v825_v20 = vpack.c.bf16 %v824_v1, %v823_v17 }
 0xb0b   :  { %2215 = vmatmul.mubr.msk.bf16.vlgmr.msra.gmra.mxu0 %vm159_vm4, %v825_v20  ;;  %v2343_v20 = vld [vmem:[%s2937_s5 + $0x10] sm:$0xff]  }
 0xb0c   :  { %2234 = vmatprep.mubr.msk.bf16.mxu0 %vm2443_vm5, %v2442_v6 }
 0xbcb   :  { %v883_v18 = vpop.f32.mrf.mxu0 }
 0xbcc   :  { %v884_v24 = vadd.f32 %v883_v18, %v833_v23 }
 0xbcd   :  { %v2216_v25 = vpop.f32.mrf.mxu0 }
 0xbce   :  { %v892_v26 = vmul.f32 0.044715, %v884_v24  ;;  %v890_v43 = vmul.f32 0.5, %v884_v24 }
 0xbcf   :  { %v886_v27 = vpop.f32.mrf.mxu0 }
 0xbd0   :  { %v894_v28 = vmul.f32 %v892_v26, %v884_v24  ;;  %v887_v29 = vadd.f32 %v886_v27, %v833_v23 }
 0xbd1   :  { %v2217_v30 = vpop.f32.mrf.mxu0 }
 0xbd2   :  { %v896_v32 = vmul.f32 %v894_v28, %v884_v24  ;;  %v893_v33 = vmul.f32 0.044715, %v887_v29  ;;  %v891_v44 = vmul.f32 0.5, %v887_v29  ;;  %v2766_v28 = vsub.s32 3, %v2581_v48 }
 0xbd4   :  { %v898_v34 = vadd.f32 %v896_v32, %v884_v24  ;;  %v895_v35 = vmul.f32 %v893_v33, %v887_v29  ;;  %v2761_v24 = vsub.s32 2, %v2581_v48  ;;  %v1027_v33 = vrot.slane %v2742_v7, %v2766_v28  ;;  %v2349_v48 = vld [vmem:[%s2940_s8 + $0x30] sm:$0xff]  }
 0xbd6   :  { %v900_v36 = vmul.f32 0.7978846, %v898_v34  ;;  %v897_v37 = vmul.f32 %v895_v35, %v887_v29  ;;  %v1021_v27 = vrot.slane %v2742_v7, %v2761_v24 }
 0xbd8   :  { %2380 = vtanh.f32 %v900_v36  ;;  %v899_v38 = vadd.f32 %v897_v37, %v887_v29 }
 0xbda   :  { %v901_v39 = vmul.f32 0.7978846, %v899_v38  ;;  %v1039_v38 = vrot.slane %v2742_v7, %v245_v63 }
 0xbdc   :  { %2382 = vtanh.f32 %v901_v39 }
 0xbe5   :  { %v2381_v40 = vpop.eup %2380 }
 0xbe6   :  { %v904_v41 = vadd.f32 1.0, %v2381_v40 }
 0xbe8   :  { %v906_v46 = vmul.f32 %v904_v41, %v890_v43 }
 0xbe9   :  { %v2383_v42 = vpop.eup %2382 }
 0xbea   :  { %v905_v45 = vadd.f32 1.0, %v2383_v42 }
 0xbec   :  { %v907_v47 = vmul.f32 %v905_v45, %v891_v44 }
 0xbee   :  { %v908_v51 = vpack.c.bf16 %v907_v47, %v906_v46 }
 0xbf0   :  { %2227 = vmatmul.mubr.msk.bf16.vlgmr.msra.gmra.mxu1 %vm945_vm15, %v908_v51 }
 0xcb0   :  { %v983_v60 = vpop.f32.mrf.mxu1 }
 0xcb1   :  { %v984_v53 = vadd.f32 %v983_v60, %v920_v52 }
 0xcb2   :  { %v2228_v55 = vpop.f32.mrf.mxu1 }
 0xcb3   :  { %v990_v61 = vadd.f32 %v984_v53, %v823_v17 }
 0xcb4   :  { %v986_v56 = vpop.f32.mrf.mxu1 }
 0xcb5   :  { %v987_v57 = vadd.f32 %v986_v56, %v920_v52  ;;  %v992_v58 = vsel %vm159_vm4, %v990_v61, 0.0 }
 0xcb6   :  { %993 = vadd.xlane.f32.xlu1 %v992_v58  ;;  %v2229_v59 = vpop.f32.mrf.mxu1 }
 0xcb7   :  { %v991_v62 = vadd.f32 %v987_v57, %v824_v1  ;;  %v2342_v1 = vld [vmem:[%s2937_s5 + $0x18] sm:$0xff]  }
 0xcb8   :  { %2231 = vmatpush3.bf16.msra.mxu0 %v2342_v1 }
 0xcb9   :  { %v995_v0 = vsel %vm159_vm4, %v991_v62, 0.0  ;;  %2232 = vmatprep.subr.bf16.mxu0 %v2442_v6 }
 0xcba   :  { %996 = vadd.xlane.f32.xlu0 %v995_v0 }
 0xcbc   :  { %2233 = vmatpush3.bf16.msra.mxu0 %v2343_v20 }
 0xd3f   :  { %v994_v2 = vpop.xlane.xlu1 %993 }
 0xd40   :  { %v998_v5 = vmul.f32 0.03125, %v994_v2 }
 0xd42   :  { %v1000_v8 = vsub.f32 %v990_v61, %v998_v5 }
 0xd43   :  { %v997_v9 = vpop.xlane.xlu0 %996 }
 0xd44   :  { %v999_v11 = vmul.f32 0.03125, %v997_v9  ;;  %v1002_v12 = vmul.f32 %v1000_v8, %v1000_v8 }
 0xd46   :  { %v1001_v13 = vsub.f32 %v991_v62, %v999_v11  ;;  %v1004_v14 = vsel %vm159_vm4, %v1002_v12, 0.0 }
 0xd47   :  { %1005 = vadd.xlane.f32.xlu1 %v1004_v14 }
 0xd48   :  { %v1003_v16 = vmul.f32 %v1001_v13, %v1001_v13 }
 0xd4a   :  { %v1007_v17 = vsel %vm159_vm4, %v1003_v16, 0.0 }
 0xd4b   :  { %1008 = vadd.xlane.f32.xlu0 %v1007_v17 }
 0xdd0   :  { %v1006_v21 = vpop.xlane.xlu1 %1005 }
 0xdd1   :  { %v1010_v22 = vmul.f32 0.03125, %v1006_v21 }
 0xdd3   :  { %v1012_v50 = vadd.f32 1e-12, %v1010_v22 }
 0xdd4   :  { %v1009_v3 = vpop.xlane.xlu0 %1008 }
 0xdd5   :  { %2384 = vrsqrt.f32 %v1012_v50  ;;  %v1011_v23 = vmul.f32 0.03125, %v1009_v3 }
 0xdd7   :  { %v1013_v18 = vadd.f32 1e-12, %v1011_v23 }
 0xdd9   :  { %2386 = vrsqrt.f32 %v1013_v18 }
 0xde2   :  { %v2385_v25 = vpop.eup %2384 }
 0xde3   :  { %v1016_v26 = vmul.f32 %v2385_v25, %v1000_v8 }
 0xde5   :  { %v1022_v32 = vmul.f32 %v1021_v27, %v1016_v26 }
 0xde6   :  { %v2387_v29 = vpop.eup %2386 }
 0xde7   :  { %v1017_v30 = vmul.f32 %v2387_v29, %v1001_v13  ;;  %v2770_v35 = vadd.f32 %v1027_v33, %v1022_v32 }
 0xde9   :  { %v1023_v34 = vmul.f32 %v1021_v27, %v1017_v30 }
 0xdeb   :  { %v2772_v36 = vadd.f32 %v1027_v33, %v1023_v34 }
 0xded   :  { %v1030_v37 = vpack.c.bf16 %v2772_v36, %v2770_v35 }
 0xdef   :  { %2235 = vmatmul.mubr.msk.bf16.vlgmr.msra.gmra.mxu0 %vm159_vm4, %v1030_v37 }
 0xeaf   :  { %v1089_v39 = vpop.f32.mrf.mxu0 }
 0xeb0   :  { %v2780_v40 = vadd.f32 %v1089_v39, %v1039_v38 }
 0xeb1   :  { %v2236_v41 = vpop.f32.mrf.mxu0 }
 0xeb2   :  { %1098 = vrot.lane.b32.xlu0 %v2780_v40, %s2444_s13  ;;  %2242 = vmatprep.mubr.msk.f32.mxu0 %vm309_vm6, %v2780_v40 }
 0xeb3   :  { %v1092_v42 = vpop.f32.mrf.mxu0 }
 0xeb4   :  { %v1093_v43 = vadd.f32 %v1092_v42, %v1039_v38 }
 0xeb5   :  { %v2237_v44 = vpop.f32.mrf.mxu0 }
 0xeb6   :  { %1298 = vrot.lane.b32.xlu0 %v2780_v40, %s2448_s17  ;;  %1100 = vrot.lane.b32.xlu1 %v1093_v43, %s2444_s13 }
 0xeba   :  { %1304 = vrot.lane.b32.xlu1 %v1093_v43, %s2447_s16 }
 0xebe   :  { %1302 = vrot.lane.b32.xlu1 %v2780_v40, %s2447_s16 }
 0xec2   :  { %1300 = vrot.lane.b32.xlu1 %v1093_v43, %s2448_s17 }
 0xf24   :  { %v1099_v63 = vpop.permute.xlu0 %1098 }
 0xf28   :  { %v1299_v45 = vpop.permute.xlu0 %1298  ;;  %v1101_v46 = vpop.permute.xlu1 %1100 }
 0xf29   :  { %2238 = vmatprep.subr.msk.mxu0 %vm309_vm6, %v1101_v46  ;;  %2256 = vmatprep.mubr.msk.f32.mxu1 %vm309_vm6, %v1299_v45 }
 0xf2a   :  { %2239 = vmatpush3.xpose.msk.msra.mxu0 %vm309_vm6, %v1101_v46 }
 0xf2b   :  { %2240 = vmatprep.subr.msk.mxu0 %vm309_vm6, %v1099_v63 }
 0xf2c   :  { %v1305_v47 = vpop.permute.xlu1 %1304 }
 0xf2d   :  { %2252 = vmatprep.subr.msk.mxu1 %vm309_vm6, %v1305_v47 }
 0xf2e   :  { %2241 = vmatpush3.xpose.msk.msra.mxu0 %vm309_vm6, %v1099_v63  ;;  %2253 = vmatpush3.xpose.msk.msra.mxu1 %vm309_vm6, %v1305_v47 }
 0xf30   :  { %v1303_v51 = vpop.permute.xlu1 %1302 }
 0xf31   :  { %2243 = vmatmul.mubr.msk.f32.vlgmr.msra.gmra.mxu0 %vm309_vm6, %v1093_v43  ;;  %2254 = vmatprep.subr.msk.mxu1 %vm309_vm6, %v1303_v51 }
 0xf32   :  { %2255 = vmatpush3.xpose.msk.msra.mxu1 %vm309_vm6, %v1303_v51 }
 0xf33   :  { %2266 = vmatprep.subr.bf16.mxu1 %v2442_v6 }
 0xf34   :  { %v1301_v52 = vpop.permute.xlu1 %1300 }
 0xf35   :  { %2257 = vmatmul.mubr.msk.f32.vlgmr.msra.gmra.mxu1 %vm309_vm6, %v1301_v52 }
 0xf36   :  { %2270 = vmatprep.mubr.msk.bf16.mxu1 %vm2443_vm5, %v2442_v6 }
 0xff1   :  { %v2244_v60 = vpop.f32.mrf.mxu0 }
 0xff2   :  { %v1186_v53 = vmul.f32 0.25, %v2244_v60  ;;  %v2344_v60 = vld [vmem:[%s2938_s6 + $0x18] sm:$0xff]  }
 0xff3   :  { %v1176_v55 = vpop.f32.mrf.mxu0  ;;  %2267 = vmatpush3.bf16.msra.mxu1 %v2344_v60 }
 0xff4   :  { %v1185_v61 = vmul.f32 0.25, %v1176_v55  ;;  %v1188_v56 = vadd.f32 %v1186_v53, %v2633_v15  ;;  %2268 = vmatprep.subr.bf16.mxu1 %v2442_v6  ;;  %v2345_v53 = vld [vmem:[%s2938_s6 + $0x10] sm:$0xff]  }
 0xff5   :  { %v2258_v57 = vpop.f32.mrf.mxu1 }
 0xff6   :  { %v1192_v58 = vsel %vm309_vm6, %v1188_v56, -inf  ;;  %v1187_v59 = vadd.f32 %v1185_v61, %v2635_v19  ;;  %v1390_v0 = vmul.f32 0.25, %v2258_v57 }
 0xff7   :  { %1193 = vmax.xlane.f32.xlu1 %v1192_v58  ;;  %v1380_v62 = vpop.f32.mrf.mxu1  ;;  %2269 = vmatpush3.bf16.msra.mxu1 %v2345_v53 }
 0xff8   :  { %v1389_v2 = vmul.f32 0.25, %v1380_v62  ;;  %v1189_v5 = vsel %vm309_vm6, %v1187_v59, -inf  ;;  %v1392_v11 = vadd.f32 %v1390_v0, %v2633_v15  ;;  %2282 = vmatprep.subr.bf16.mxu1 %v2442_v6 }
 0xff9   :  { %1190 = vmax.xlane.f32.xlu0 %v1189_v5 }
 0xffa   :  { %v1391_v8 = vadd.f32 %v1389_v2, %v2635_v19  ;;  %v1396_v12 = vsel %vm309_vm6, %v1392_v11, -inf }
 0xffc   :  { %v1393_v9 = vsel %vm309_vm6, %v1391_v8, -inf }
 0xffd   :  { %1394 = vmax.xlane.f32.xlu0 %v1393_v9  ;;  %v1521_v9 = vrot.slane %v2742_v7, %v727_v31 }
0x1001   :  { %1397 = vmax.xlane.f32.xlu0 %v1396_v12 }
0x1008   :  { %1213 = vrot.lane.b32.xlu1 %v1093_v43, %s2446_s1 }
0x100c   :  { %1417 = vrot.lane.b32.xlu1 %v1093_v43, %s2449_s18 }
0x1080   :  { %v1194_v13 = vpop.xlane.xlu1 %1193 }
0x1081   :  { %v1196_v14 = vsub.f32 %v1188_v56, %v1194_v13 }
0x1082   :  { %v1191_v16 = vpop.xlane.xlu0 %1190 }
0x1083   :  { %v1199_v17 = vmul.f32 1.442695, %v1196_v14  ;;  %v1195_v1 = vsub.f32 %v1187_v59, %v1191_v16 }
0x1084   :  { %v1214_v20 = vpop.permute.xlu1 %1213 }
0x1085   :  { %2388 = vpow2.f32 %v1199_v17  ;;  %v1197_v19 = vmul.f32 1.442695, %v1195_v1  ;;  %2245 = vmatprep.subr.mxu0 %v1214_v20 }
0x1086   :  { %2246 = vmatpush3.msra.mxu0 %v1214_v20  ;;  %v1395_v21 = vpop.xlane.xlu0 %1394 }
0x1087   :  { %2390 = vpow2.f32 %v1197_v19  ;;  %v1399_v15 = vsub.f32 %v1391_v8, %v1395_v21 }
0x1088   :  { %v1418_v34 = vpop.permute.xlu1 %1417 }
0x1089   :  { %v1401_v22 = vmul.f32 1.442695, %v1399_v15 }
0x108a   :  { %v1398_v50 = vpop.xlane.xlu0 %1397 }
0x108b   :  { %2392 = vpow2.f32 %v1401_v22  ;;  %v1400_v3 = vsub.f32 %v1392_v11, %v1398_v50 }
0x108d   :  { %v1403_v23 = vmul.f32 1.442695, %v1400_v3 }
0x108f   :  { %2394 = vpow2.f32 %v1403_v23 }
0x1092   :  { %v2389_v18 = vpop.eup %2388 }
0x1093   :  { %v1204_v25 = vsel %vm309_vm6, %v2389_v18, 0.0 }
0x1094   :  { %v2391_v26 = vpop.eup %2390  ;;  %1205 = vadd.xlane.f32.xlu0 %v1204_v25 }
0x1095   :  { %v1201_v27 = vsel %vm309_vm6, %v2391_v26, 0.0 }
0x1096   :  { %1202 = vadd.xlane.f32.xlu1 %v1201_v27  ;;  %v2347_v27 = vld [vmem:[%s2939_s7 + $0x10] sm:$0xff]  }
0x1098   :  { %v2393_v29 = vpop.eup %2392 }
0x1099   :  { %v1405_v30 = vsel %vm309_vm6, %v2393_v29, 0.0 }
0x109a   :  { %1406 = vadd.xlane.f32.xlu1 %v1405_v30 }
0x109c   :  { %v2395_v32 = vpop.eup %2394 }
0x109d   :  { %v1408_v33 = vsel %vm309_vm6, %v2395_v32, 0.0 }
0x109e   :  { %1409 = vadd.xlane.f32.xlu0 %v1408_v33 }
0x10ab   :  { %1415 = vrot.lane.b32.xlu1 %v2780_v40, %s2449_s18 }
0x10b4   :  { %1211 = vrot.lane.b32.xlu0 %v2780_v40, %s2446_s1 }
0x111d   :  { %v1206_v37 = vpop.xlane.xlu0 %1205 }
0x111e   :  { %2396 = vrcp.f32 %v1206_v37 }
0x111f   :  { %v1203_v38 = vpop.xlane.xlu1 %1202 }
0x1120   :  { %2398 = vrcp.f32 %v1203_v38 }
0x1123   :  { %v1407_v39 = vpop.xlane.xlu1 %1406 }
0x1124   :  { %2400 = vrcp.f32 %v1407_v39 }
0x1127   :  { %v1410_v41 = vpop.xlane.xlu0 %1409  ;;  %v1416_v46 = vpop.permute.xlu1 %1415 }
0x1128   :  { %2402 = vrcp.f32 %v1410_v41  ;;  %v1609_v41 = vrot.slane %v2742_v7, %v815_v4  ;;  %v2348_v4 = vld [vmem:[%s2940_s8 + $0x38] sm:$0xff]  }
0x112b   :  { %v1212_v42 = vpop.permute.xlu0 %1211  ;;  %v2397_v43 = vpop.eup %2396 }
0x112c   :  { %2247 = vmatprep.subr.mxu0 %v1212_v42  ;;  %v1210_v45 = vmul.f32 %v2397_v43, %v2389_v18 }
0x112d   :  { %v2399_v44 = vpop.eup %2398  ;;  %2248 = vmatpush3.msra.mxu0 %v1212_v42 }
0x112e   :  { %2259 = vmatprep.subr.mxu0 %v1418_v34  ;;  %v1208_v63 = vmul.f32 %v2399_v44, %v2391_v26 }
0x1130   :  { %2249 = vmatprep.mubr.msk.f32.mxu0 %vm309_vm6, %v1208_v63  ;;  %v1615_v63 = vrot.slane %v2742_v7, %v821_v10  ;;  %v2350_v10 = vld [vmem:[%s2940_s8 + $0x28] sm:$0xff]   ;;  %v2351_v7 = vld [vmem:[%s2940_s8 + $0x20] sm:$0xff]  }
0x1131   :  { %v2401_v40 = vpop.eup %2400  ;;  %2250 = vmatmul.mubr.msk.f32.vlgmr.msra.gmra.mxu0 %vm309_vm6, %v1210_v45 }
0x1132   :  { %2260 = vmatpush3.msra.mxu0 %v1418_v34  ;;  %v1412_v47 = vmul.f32 %v2401_v40, %v2393_v29 }
0x1133   :  { %2261 = vmatprep.subr.mxu0 %v1416_v46 }
0x1134   :  { %2262 = vmatpush3.msra.mxu0 %v1416_v46  ;;  %2263 = vmatprep.mubr.msk.f32.mxu0 %vm309_vm6, %v1412_v47 }
0x1135   :  { %v2403_v51 = vpop.eup %2402  ;;  %2274 = vmatprep.subr.bf16.mxu0 %v2442_v6 }
0x1136   :  { %v1414_v52 = vmul.f32 %v2403_v51, %v2395_v32  ;;  %v2890_v51 = vld [vmem:[%s2936_s4 + $0x10] sm:$0xff] }
0x1138   :  { %2264 = vmatmul.mubr.msk.f32.vlgmr.msra.gmra.mxu0 %vm309_vm6, %v1414_v52  ;;  %v1627_v52 = vrot.slane %v2890_v51, %v2584_v49 }
0x1139   :  { %2278 = vmatprep.mubr.msk.bf16.mxu0 %vm2443_vm5, %v2442_v6 }
0x11f1   :  { %v2251_v55 = vpop.f32.mrf.mxu0 }
0x11f3   :  { %v1289_v61 = vpop.f32.mrf.mxu0 }
0x11f8   :  { %v2265_v56 = vpop.f32.mrf.mxu0 }
0x11fa   :  { %v1493_v57 = vpop.f32.mrf.mxu0 }
0x11fb   :  { %v2327_v58 = vpack.i.bf16 %v2265_v56, %v1493_v57 }
0x11fd   :  { %2328 = vrot.lane.b32.xlu0 %v2327_v58, %s2450_s23 }
0x126f   :  { %v2329_v59 = vpop.permute.xlu0 %2328 }
0x1270   :  { %v2331_v62 = vunpack.i.h.bf16 %v2329_v59  ;;  %v2330_v0 = vunpack.i.l.bf16 %v2329_v59 }
0x1272   :  { %v1511_v2 = vsel %vm309_vm6, %v2251_v55, %v2331_v62  ;;  %v1510_v5 = vsel %vm309_vm6, %v1289_v61, %v2330_v0 }
0x1273   :  { %v1512_v8 = vpack.c.bf16 %v1511_v2, %v1510_v5 }
0x1275   :  { %2271 = vmatmul.mubr.msk.bf16.vlgmr.msra.gmra.mxu1 %vm159_vm4, %v1512_v8 }
0x1276   :  { %2290 = vmatprep.mubr.msk.bf16.mxu1 %vm2443_vm5, %v2442_v6  ;;  %2283 = vmatpush3.bf16.msra.mxu1 %v2348_v4  ;;  %v1815_v4 = vrot.slane %v2890_v51, %v2761_v24 }
0x1277   :  { %2284 = vmatprep.subr.bf16.mxu1 %v2442_v6 }
0x127a   :  { %2285 = vmatpush3.bf16.msra.mxu1 %v2349_v48 }
0x127b   :  { %2286 = vmatprep.subr.bf16.mxu1 %v2442_v6 }
0x127e   :  { %2287 = vmatpush3.bf16.msra.mxu1 %v2350_v10 }
0x127f   :  { %2288 = vmatprep.subr.bf16.mxu1 %v2442_v6 }
0x1282   :  { %2289 = vmatpush3.bf16.msra.mxu1 %v2351_v7 }
0x1335   :  { %v1571_v11 = vpop.f32.mrf.mxu1 }
0x1336   :  { %v1572_v12 = vadd.f32 %v1571_v11, %v1521_v9 }
0x1337   :  { %v2272_v13 = vpop.f32.mrf.mxu1 }
0x1338   :  { %v1578_v14 = vadd.f32 %v1572_v12, %v2770_v35 }
0x1339   :  { %v1574_v16 = vpop.f32.mrf.mxu1 }
0x133a   :  { %v1575_v17 = vadd.f32 %v1574_v16, %v1521_v9  ;;  %v1580_v1 = vsel %vm159_vm4, %v1578_v14, 0.0 }
0x133b   :  { %1581 = vadd.xlane.f32.xlu1 %v1580_v1  ;;  %v2273_v20 = vpop.f32.mrf.mxu1 }
0x133c   :  { %v1579_v19 = vadd.f32 %v1575_v17, %v2772_v36  ;;  %v2346_v36 = vld [vmem:[%s2939_s7 + $0x18] sm:$0xff]  }
0x133d   :  { %2275 = vmatpush3.bf16.msra.mxu0 %v2346_v36 }
0x133e   :  { %v1583_v21 = vsel %vm159_vm4, %v1579_v19, 0.0  ;;  %2276 = vmatprep.subr.bf16.mxu0 %v2442_v6 }
0x133f   :  { %1584 = vadd.xlane.f32.xlu0 %v1583_v21 }
0x1341   :  { %2277 = vmatpush3.bf16.msra.mxu0 %v2347_v27 }
0x1342   :  { %2294 = vmatprep.subr.bf16.mxu0 %v2442_v6 }
0x13c4   :  { %v1582_v15 = vpop.xlane.xlu1 %1581 }
0x13c5   :  { %v1586_v22 = vmul.f32 0.03125, %v1582_v15  ;;  %v1715_v15 = vrot.slane %v2890_v51, %v2594_v54 }
0x13c7   :  { %v1588_v50 = vsub.f32 %v1578_v14, %v1586_v22 }
0x13c8   :  { %v1585_v31 = vpop.xlane.xlu0 %1584 }
0x13c9   :  { %v1587_v3 = vmul.f32 0.03125, %v1585_v31  ;;  %v1590_v23 = vmul.f32 %v1588_v50, %v1588_v50 }
0x13cb   :  { %v1589_v18 = vsub.f32 %v1579_v19, %v1587_v3  ;;  %v1592_v35 = vsel %vm159_vm4, %v1590_v23, 0.0 }
0x13cc   :  { %1593 = vadd.xlane.f32.xlu0 %v1592_v35 }
0x13cd   :  { %v1591_v25 = vmul.f32 %v1589_v18, %v1589_v18 }
0x13cf   :  { %v1595_v26 = vsel %vm159_vm4, %v1591_v25, 0.0 }
0x13d0   :  { %1596 = vadd.xlane.f32.xlu1 %v1595_v26 }
0x1455   :  { %v1594_v29 = vpop.xlane.xlu0 %1593 }
0x1456   :  { %v1598_v30 = vmul.f32 0.03125, %v1594_v29 }
0x1458   :  { %v1600_v32 = vadd.f32 1e-12, %v1598_v30 }
0x1459   :  { %v1597_v33 = vpop.xlane.xlu1 %1596 }
0x145a   :  { %2404 = vrsqrt.f32 %v1600_v32  ;;  %v1599_v34 = vmul.f32 0.03125, %v1597_v33 }
0x145c   :  { %v1601_v37 = vadd.f32 1e-12, %v1599_v34 }
0x145e   :  { %2406 = vrsqrt.f32 %v1601_v37 }
0x1467   :  { %v2405_v38 = vpop.eup %2404 }
0x1468   :  { %v1604_v39 = vmul.f32 %v2405_v38, %v1588_v50 }
0x146a   :  { %v1610_v44 = vmul.f32 %v1609_v41, %v1604_v39 }
0x146b   :  { %v2407_v42 = vpop.eup %2406 }
0x146c   :  { %v1605_v43 = vmul.f32 %v2407_v42, %v1589_v18  ;;  %v1616_v40 = vadd.f32 %v1615_v63, %v1610_v44  ;;  %v2353_v42 = vld [vmem:[%s2941_s9] sm:$0xff]  }
0x146e   :  { %v1611_v45 = vmul.f32 %v1609_v41, %v1605_v43  ;;  %v2352_v41 = vld [vmem:[%s2941_s9 + $0x8] sm:$0xff]  }
0x1470   :  { %v1617_v46 = vadd.f32 %v1615_v63, %v1611_v45 }
0x1472   :  { %v1618_v47 = vpack.c.bf16 %v1617_v46, %v1616_v40 }
0x1474   :  { %2279 = vmatmul.mubr.msk.bf16.vlgmr.msra.gmra.mxu0 %vm159_vm4, %v1618_v47 }
0x1475   :  { %2298 = vmatprep.mubr.msk.bf16.mxu0 %vm2443_vm5, %v2442_v6  ;;  %2295 = vmatpush3.bf16.msra.mxu0 %v2352_v41 }
0x1476   :  { %2296 = vmatprep.subr.bf16.mxu0 %v2442_v6 }
0x1479   :  { %2297 = vmatpush3.bf16.msra.mxu0 %v2353_v42 }
0x147a   :  { %2302 = vmatprep.subr.bf16.mxu0 %v2442_v6 }
0x1534   :  { %v1677_v60 = vpop.f32.mrf.mxu0 }
0x1535   :  { %v1678_v53 = vadd.f32 %v1677_v60, %v1627_v52 }
0x1536   :  { %v2280_v55 = vpop.f32.mrf.mxu0 }
0x1537   :  { %v1686_v61 = vmul.f32 0.044715, %v1678_v53  ;;  %v1684_v16 = vmul.f32 0.5, %v1678_v53 }
0x1538   :  { %v1680_v56 = vpop.f32.mrf.mxu0 }
0x1539   :  { %v1688_v57 = vmul.f32 %v1686_v61, %v1678_v53  ;;  %v1681_v58 = vadd.f32 %v1680_v56, %v1627_v52  ;;  %v1821_v52 = vrot.slane %v2890_v51, %v2766_v28  ;;  %v2355_v51 = vld [vmem:[%s2942_s10] sm:$0xff]  }
0x153a   :  { %v2281_v59 = vpop.f32.mrf.mxu0 }
0x153b   :  { %v1690_v62 = vmul.f32 %v1688_v57, %v1678_v53  ;;  %v1687_v0 = vmul.f32 0.044715, %v1681_v58  ;;  %v1685_v17 = vmul.f32 0.5, %v1681_v58  ;;  %v2354_v59 = vld [vmem:[%s2942_s10 + $0x8] sm:$0xff]   ;;  %s2451_s10 = smov [#allocation2]  }
0x153c   :  { %s1965_s5 = sshll.u32 %s2451_s10, 4  ;;  %s1966_s5 = int_to_ptr.vmem [resolvable:$true] %s1965_s5 }
0x153d   :  { %v1692_v2 = vadd.f32 %v1690_v62, %v1678_v53  ;;  %v1689_v5 = vmul.f32 %v1687_v0, %v1681_v58  ;;  %v2418_v62 = vld [vmem:[%s2936_s4] sm:$0xff]  ;;  %s2419_s4 = scalar_lea.vmem %s1966_s5, 32  ;;  %p2424_p1 = scmp.lt.s32.totalorder %s1966_s5, %s1966_s5 }
0x153e   :  { %v1837_v0 = vrot.slane %v2418_v62, %v2761_v24  ;;  %p2420_p0 = scmp.ne.s32.totalorder %s1966_s5, %s2419_s4  ;;  %p2425_p2 = scmp.lt.s32.totalorder %s2419_s4, %s2419_s4 }
0x153f   :  { %v1694_v8 = vmul.f32 0.7978846, %v1692_v2  ;;  %v1691_v9 = vmul.f32 %v1689_v5, %v1681_v58 }
0x1540   :  { %p2426_p3 = por %p2425_p2, %p2424_p1 }
0x1541   :  { %2408 = vtanh.f32 %v1694_v8  ;;  %v1693_v11 = vadd.f32 %v1691_v9, %v1681_v58 }
0x1542   :  { %p2427_p4 = pnand %p2426_p3, %p2420_p0 }
0x1543   :  { %v1695_v12 = vmul.f32 0.7978846, %v1693_v11 }
0x1545   :  { %2410 = vtanh.f32 %v1695_v12 }
0x154e   :  { %v2409_v13 = vpop.eup %2408 }
0x154f   :  { %v1698_v49 = vadd.f32 1.0, %v2409_v13 }
0x1551   :  { %v1700_v20 = vmul.f32 %v1698_v49, %v1684_v16 }
0x1552   :  { %v2411_v14 = vpop.eup %2410 }
0x1553   :  { %v1699_v1 = vadd.f32 1.0, %v2411_v14 }
0x1555   :  { %v1701_v19 = vmul.f32 %v1699_v1, %v1685_v17 }
0x1557   :  { %v1702_v21 = vpack.c.bf16 %v1701_v19, %v1700_v20 }
0x1559   :  { %2291 = vmatmul.mubr.msk.bf16.vlgmr.msra.gmra.mxu1 %vm945_vm15, %v1702_v21 }
0x1619   :  { %v1777_v22 = vpop.f32.mrf.mxu1 }
0x161a   :  { %v1778_v50 = vadd.f32 %v1777_v22, %v1715_v15 }
0x161b   :  { %v2292_v31 = vpop.f32.mrf.mxu1 }
0x161c   :  { %v1784_v3 = vadd.f32 %v1778_v50, %v1616_v40 }
0x161d   :  { %v1780_v23 = vpop.f32.mrf.mxu1 }
0x161e   :  { %v1781_v18 = vadd.f32 %v1780_v23, %v1715_v15  ;;  %v1786_v35 = vsel %vm159_vm4, %v1784_v3, 0.0 }
0x161f   :  { %1787 = vadd.xlane.f32.xlu1 %v1786_v35  ;;  %v2293_v25 = vpop.f32.mrf.mxu1 }
0x1620   :  { %v1785_v26 = vadd.f32 %v1781_v18, %v1617_v46 }
0x1622   :  { %v1789_v36 = vsel %vm159_vm4, %v1785_v26, 0.0 }
0x1623   :  { %1790 = vadd.xlane.f32.xlu0 %v1789_v36 }
0x16a8   :  { %v1788_v27 = vpop.xlane.xlu1 %1787 }
0x16a9   :  { %v1792_v29 = vmul.f32 0.03125, %v1788_v27 }
0x16ab   :  { %v1794_v30 = vsub.f32 %v1784_v3, %v1792_v29 }
0x16ac   :  { %v1791_v32 = vpop.xlane.xlu0 %1790 }
0x16ad   :  { %v1793_v33 = vmul.f32 0.03125, %v1791_v32  ;;  %v1796_v54 = vmul.f32 %v1794_v30, %v1794_v30 }
0x16af   :  { %v1795_v34 = vsub.f32 %v1785_v26, %v1793_v33  ;;  %v1798_v37 = vsel %vm159_vm4, %v1796_v54, 0.0 }
0x16b0   :  { %1799 = vadd.xlane.f32.xlu1 %v1798_v37 }
0x16b1   :  { %v1797_v38 = vmul.f32 %v1795_v34, %v1795_v34 }
0x16b3   :  { %v1801_v39 = vsel %vm159_vm4, %v1797_v38, 0.0 }
0x16b4   :  { %1802 = vadd.xlane.f32.xlu0 %v1801_v39 }
0x1739   :  { %v1800_v43 = vpop.xlane.xlu1 %1799 }
0x173a   :  { %v1804_v44 = vmul.f32 0.03125, %v1800_v43 }
0x173c   :  { %v1806_v63 = vadd.f32 1e-12, %v1804_v44 }
0x173d   :  { %v1803_v45 = vpop.xlane.xlu0 %1802 }
0x173e   :  { %2412 = vrsqrt.f32 %v1806_v63  ;;  %v1805_v40 = vmul.f32 0.03125, %v1803_v45 }
0x1740   :  { %v1807_v46 = vadd.f32 1e-12, %v1805_v40 }
0x1742   :  { %2414 = vrsqrt.f32 %v1807_v46 }
0x174b   :  { %v2413_v47 = vpop.eup %2412 }
0x174c   :  { %v1810_v48 = vmul.f32 %v2413_v47, %v1794_v30 }
0x174e   :  { %v1816_v60 = vmul.f32 %v1815_v4, %v1810_v48 }
0x174f   :  { %v2415_v10 = vpop.eup %2414 }
0x1750   :  { %v1811_v7 = vmul.f32 %v2415_v10, %v1795_v34  ;;  %v1822_v61 = vadd.f32 %v1821_v52, %v1816_v60 }
0x1752   :  { %v1817_v53 = vmul.f32 %v1815_v4, %v1811_v7 }
0x1754   :  { %v1823_v55 = vadd.f32 %v1821_v52, %v1817_v53 }
0x1756   :  { %v1825_v56 = vrot.slane %v1823_v55, 7 }
0x1758   :  { %v1828_v57 = vsel %vm1827_vm0, %v1822_v61, %v1825_v56 }
0x1759   :  { %v1829_v58 = vpack.c.bf16 %v1828_v57, %v1828_v57 }
0x175b   :  { %2299 = vmatmul.mubr.msk.bf16.vlgmr.msra.gmra.mxu0 %vm159_vm4, %v1829_v58 }
0x175c   :  { %2306 = vmatprep.mubr.msk.bf16.mxu0 %vm2443_vm5, %v2442_v6  ;;  %2303 = vmatpush3.bf16.msra.mxu0 %v2354_v59 }
0x175d   :  { %2304 = vmatprep.subr.bf16.mxu0 %v2442_v6  ;;  %v1902_v6 = vrot.slane %v2418_v62, %v2766_v28 }
0x1760   :  { %2305 = vmatpush3.bf16.msra.mxu0 %v2355_v51 }
0x181b   :  { %v1887_v2 = vpop.f32.mrf.mxu0 }
0x181c   :  { %v1888_v5 = vadd.f32 %v1887_v2, %v1837_v0 }
0x181d   :  { %v2300_v8 = vpop.f32.mrf.mxu0 }
0x181e   :  { %2416 = vtanh.f32 %v1888_v5 }
0x181f   :  { %v1890_v9 = vpop.f32.mrf.mxu0 }
0x1821   :  { %v2301_v11 = vpop.f32.mrf.mxu0 }
0x182b   :  { %v2417_v12 = vpop.eup %2416 }
0x182c   :  { %v1894_v13 = vpack.c.bf16 %v2417_v12, %v2417_v12 }
0x182e   :  { %2307 = vmatmul.mubr.msk.bf16.vlgmr.msra.gmra.mxu0 %vm159_vm4, %v1894_v13 }
0x18ee   :  { %v1952_v49 = vpop.f32.mrf.mxu0 }
0x18ef   :  { %v1953_v14 = vadd.f32 %v1952_v49, %v1902_v6 }
0x18f0   :  { %v2308_v16 = vpop.f32.mrf.mxu0 }
0x18f1   :  { %1958 = vst [vmem:[#allocation2] sm:$0x3] %v1953_v14 }
0x18f2   :  { %v1955_v24 = vpop.f32.mrf.mxu0 }
0x18f3   :  { %2430 = shalt.err (!%p2427_p4)
}
0x18f4   :  { %1968 = dma.vmem_to_hbm [thread:$0]  %s1966_s5, 32, %s2943_s11, [#allocation3]   ;;  %v2309_v28 = vpop.f32.mrf.mxu0 }
0x18f5   :  { %2439 = dma.done.wait [#allocation3], 32  }
0x18f6   :  { %2440 = vsyncadd [#allocation3], 4294967264 }
0x18f7   :  { %1972 = vsyncpa [#allocation3], 1 }

</bundles_post_ra>
